<compile_context>
chip_gen: v5e
topology: v5e:2x2
jax: 0.10.0
libtpu: 0.0.40
codegen_flags: <defaults>
</compile_context>

<pallas_src>
import functools

import jax
import jax.numpy as jnp
import numpy as np
from jax import lax
from jax.experimental import pallas as pl
from jax.experimental.pallas import tpu as pltpu


def _part_head_kernel(x_ref, w1_ref, bn_b_ref, wf_ref, fb_ref, o_ref, *, s_chunk):
    # x_ref:  (B_tile, S, C) f32 spatial slab of the current (part, batch-tile)
    # w1_ref: (C, 256) bf16   folded (BN-scale, 1/S) local 1x1 conv weight
    # bn_b:   (1, 256) f32    folded BN bias (beta - mean*scale)
    # wf_ref: (256, NC_pad) bf16 ; fb_ref: (1, NC_pad) f32 ; o_ref: (B_tile, NC_pad) f32
    Bt, S, C = x_ref.shape
    n_chunks = S // s_chunk

    # Adaptive avg pool over S: chunked f32 accumulation (no whole-slab temp).
    def body(i, acc):
        start = pl.multiple_of(i * s_chunk, s_chunk)
        blk = x_ref[:, pl.ds(start, s_chunk), :]           # (Bt, s_chunk, C) f32
        return acc + jnp.sum(blk, axis=1)

    pooled = lax.fori_loop(0, n_chunks, body,
                           jnp.zeros((Bt, C), jnp.float32),
                           unroll=(n_chunks <= 8))         # (Bt, C) f32 sum; 1/S folded into w1

    # dropout (p=0.5): eval mode == identity (see TODO above)

    # local 1x1 conv (2048 -> 256): bf16 x bf16 on the MXU, f32 accumulate.
    h = jnp.dot(pooled.astype(jnp.bfloat16), w1_ref[...],
                preferred_element_type=jnp.float32)        # (Bt, 256)
    h = jnp.maximum(h + bn_b_ref[...], 0.0)                # folded BN bias + ReLU

    # per-part fc: bf16 x bf16, f32 accumulate, lane-dense padded output store.
    logits = jnp.dot(h.astype(jnp.bfloat16), wf_ref[...],
                     preferred_element_type=jnp.float32) + fb_ref[...]
    o_ref[...] = logits.astype(o_ref.dtype)


def _pick_b_tile(B, S, C):
    # Keep one f32 feature tile <= ~24 MiB (the pipeline double-buffers it), so
    # it fits v5e's and v7x's scoped VMEM with headroom; prefer MXU-sized tiles.
    budget = 24 << 20
    for bt in (256, 128, 64, 32, 16, 8):
        if B % bt == 0 and bt * S * C * 4 <= budget:
            return bt
    return B  # small / odd batch: one tile equal to the full batch dim


def part_based_cnn_head(feat_nhwc, w1, bn_gamma, bn_beta, bn_mean, bn_var, bn_eps,
                        wf, fc_bias, num_part):
    """feat_nhwc: (B, H, W, 2048) backbone output, NHWC, f32.

    w1: (P, 2048, 256)  local 1x1 conv weights (as matmul matrices)
    bn_gamma/beta/mean/var: (P, 256) eval-mode BatchNorm parameters + running stats
    wf: (P, 256, num_class) fc weights (stored transposed), fc_bias: (P, num_class)
    Returns a stacked (P, B, num_class) f32 array of per-part logits.
    """
    B, H, W, C = feat_nhwc.shape
    P = num_part
    assert H % P == 0, "adaptive pool simplification assumes H divisible by num_part"
    Hp = H // P
    S = Hp * W
    NC = wf.shape[-1]
    NC_pad = ((NC + 127) // 128) * 128               # lane-dense class dim

    # Zero-copy regroup of spatial rows by part: (B,H,W,C) -> (B,P,S,C), kept f32.
    x = feat_nhwc.reshape(B, P, S, C)

    # Fold eval-mode BN (including running mean) and the 1/S of the avg pool:
    #   mean_s(x)@W*scale + (beta - mean*scale) == sum_s(x) @ (W*scale/S) + bias_fold
    bn_scale = bn_gamma / jnp.sqrt(bn_var + bn_eps)                       # (P, 256)
    bn_bias = bn_beta - bn_mean * bn_scale                                # (P, 256)
    w1_f = (w1 * (bn_scale[:, None, :] / np.float32(S))).astype(jnp.bfloat16)
    bn_b = bn_bias.reshape(P, 1, 256).astype(jnp.float32)

    # Pad class dim to a lane multiple; fc weights in bf16 (std=0.001 -> safe).
    wf_p = jnp.pad(wf, ((0, 0), (0, 0), (0, NC_pad - NC))).astype(jnp.bfloat16)
    fb_p = jnp.pad(fc_bias, ((0, 0), (0, NC_pad - NC))).reshape(P, 1, NC_pad).astype(jnp.float32)

    B_tile = _pick_b_tile(B, S, C)
    n_btiles = B // B_tile
    s_chunk = next(c for c in (8, 4, 2, 1) if S % c == 0)

    kernel = functools.partial(_part_head_kernel, s_chunk=s_chunk)

    out = pl.pallas_call(
        kernel,
        out_shape=jax.ShapeDtypeStruct((P, B, NC_pad), jnp.float32),
        grid=(P, n_btiles),                           # P outer, batch tiles inner:
        in_specs=[                                    # weight blocks reused across b
            pl.BlockSpec((B_tile, None, S, C), lambda p, b: (b, p, 0, 0)),   # x slab (f32)
            pl.BlockSpec((None, C, 256), lambda p, b: (p, 0, 0)),            # folded conv W (bf16)
            pl.BlockSpec((None, 1, 256), lambda p, b: (p, 0, 0)),            # folded BN bias
            pl.BlockSpec((None, 256, NC_pad), lambda p, b: (p, 0, 0)),       # fc W (bf16, padded)
            pl.BlockSpec((None, 1, NC_pad), lambda p, b: (p, 0, 0)),         # fc bias (padded)
        ],
        out_specs=pl.BlockSpec((None, B_tile, NC_pad), lambda p, b: (p, b, 0)),
        compiler_params=pltpu.CompilerParams(
            dimension_semantics=("parallel", "parallel"),
            vmem_limit_bytes=48 << 20),               # raised above default; fits v7x's 64 MiB
    )(x, w1_f, bn_b, wf_p, fb_p)

    # Single slice to strip the class-dim padding; keep the stacked layout.
    return out[:, :, :NC]


def _reference(feat_nhwc, w1, gamma, beta, mean, var, eps, wf, fc_bias, num_part):
    B, H, W, C = feat_nhwc.shape
    Hp = H // num_part
    outs = []
    for p in range(num_part):
        pooled = feat_nhwc[:, p * Hp:(p + 1) * Hp, :, :].mean(axis=(1, 2))    # (B, C)
        conv = pooled @ w1[p]
        bn = (conv - mean[p]) / np.sqrt(var[p] + eps) * gamma[p] + beta[p]
        h = np.maximum(bn, 0.0)
        outs.append(h @ wf[p] + fc_bias[p])
    return np.stack(outs, axis=0)                                            # (P, B, NC)


if __name__ == "__main__":
    # small, deterministic problem: batch=2, num_part=4, num_class=8
    B, C, H, W = 2, 2048, 8, 4
    NUM_PART, NUM_CLASS = 4, 8

    key = jax.random.PRNGKey(0)
    k_feat, k_w1, k_wf, k_mean, k_var = jax.random.split(key, 5)

    # stand-in ResNet-50 backbone feature map, NHWC (see TODO about the backbone)
    feat = jax.random.normal(k_feat, (B, H, W, C), dtype=jnp.float32)

    # local 1x1 conv weights: kaiming_normal_(mode='fan_out', relu) -> std = sqrt(2/256)
    w1 = jax.random.normal(k_w1, (NUM_PART, C, 256), dtype=jnp.float32) * np.sqrt(2.0 / 256.0)

    # BatchNorm2d(256) eval: gamma=1, beta=0; nonzero running stats to exercise the fold
    eps = 1e-5
    bn_gamma = jnp.ones((NUM_PART, 256), dtype=jnp.float32)
    bn_beta = jnp.zeros((NUM_PART, 256), dtype=jnp.float32)
    bn_mean = 0.1 * jax.random.normal(k_mean, (NUM_PART, 256), dtype=jnp.float32)
    bn_var = 1.0 + 0.5 * jax.random.uniform(k_var, (NUM_PART, 256), dtype=jnp.float32)

    # fc weights: normal(std=0.001), bias 0  (stored as (256, num_class) = W.T)
    wf = jax.random.normal(k_wf, (NUM_PART, 256, NUM_CLASS), dtype=jnp.float32) * 0.001
    fc_bias = jnp.zeros((NUM_PART, NUM_CLASS), dtype=jnp.float32)

    out = part_based_cnn_head(feat, w1, bn_gamma, bn_beta, bn_mean, bn_var, eps,
                              wf, fc_bias, NUM_PART)
    out = jax.block_until_ready(out)

    ref = _reference(np.asarray(feat), np.asarray(w1), np.asarray(bn_gamma),
                     np.asarray(bn_beta), np.asarray(bn_mean), np.asarray(bn_var),
                     eps, np.asarray(wf), np.asarray(fc_bias), NUM_PART)

    # bf16 conv / fc weights + bf16 matmul inputs -> relaxed tolerances vs f32 reference
    np.testing.assert_allclose(np.asarray(out), ref, rtol=5e-2, atol=3e-3)

    print("KERNEL_OK")
</pallas_src>

<mosaic_0001>
module attributes {stable_mosaic.version = 11 : i64} {
  func.func @_part_head_kernel(%arg0: i32, %arg1: i32, %arg2: memref<2x1x8x2048xf32, #tpu.memory_space<vmem>>, %arg3: memref<1x2048x256xbf16, #tpu.memory_space<vmem>>, %arg4: memref<1x1x256xf32, #tpu.memory_space<vmem>>, %arg5: memref<1x256x128xbf16, #tpu.memory_space<vmem>>, %arg6: memref<1x1x128xf32, #tpu.memory_space<vmem>>, %arg7: memref<1x2x128xf32, #tpu.memory_space<vmem>>) attributes {dimension_semantics = [#tpu.dimension_semantics<parallel>, #tpu.dimension_semantics<parallel>], iteration_bounds = array<i64: 4, 1>, scalar_prefetch = 0 : i64, scratch_operands = 0 : i64, tpu.core_type = #tpu.core_type<tc>, window_params = [{transform_indices = @transform_0, window_bounds = array<i64: 2, 1, 8, 2048>}, {transform_indices = @transform_1, window_bounds = array<i64: 1, 2048, 256>}, {transform_indices = @transform_2, window_bounds = array<i64: 1, 1, 256>}, {transform_indices = @transform_3, window_bounds = array<i64: 1, 256, 128>}, {transform_indices = @transform_4, window_bounds = array<i64: 1, 1, 128>}, {transform_indices = @transform_5, window_bounds = array<i64: 1, 2, 128>}]} {
    %cst = arith.constant 0.000000e+00 : f32
    %0 = vector.broadcast %cst : f32 to vector<2x2048xf32>
    %c0_i32 = arith.constant 0 : i32
    %c8_i32 = arith.constant 8 : i32
    %1 = arith.muli %c0_i32, %c8_i32 : i32
    %2 = tpu.assume_multiple %1, 8 : i32
    %c0 = arith.constant 0 : index
    %c0_0 = arith.constant 0 : index
    %3 = arith.index_cast %2 : i32 to index
    %c0_1 = arith.constant 0 : index
    %4 = vector.load %arg2[%c0, %c0_0, %3, %c0_1] : memref<2x1x8x2048xf32, #tpu.memory_space<vmem>>, vector<2x1x8x2048xf32>
    %5 = vector.shape_cast %4 : vector<2x1x8x2048xf32> to vector<2x8x2048xf32>
    %cst_2 = arith.constant dense<0.000000e+00> : vector<2x2048xf32>
    %6 = vector.multi_reduction <add>, %5, %cst_2 [1] : vector<2x8x2048xf32> to vector<2x2048xf32>
    %7 = arith.addf %0, %6 : vector<2x2048xf32>
    %c1_i32 = arith.constant 1 : i32
    %8 = arith.truncf %7 : vector<2x2048xf32> to vector<2x2048xbf16>
    %c0_3 = arith.constant 0 : index
    %c0_4 = arith.constant 0 : index
    %c0_5 = arith.constant 0 : index
    %9 = vector.load %arg3[%c0_3, %c0_4, %c0_5] : memref<1x2048x256xbf16, #tpu.memory_space<vmem>>, vector<1x2048x256xbf16>
    %10 = vector.shape_cast %9 : vector<1x2048x256xbf16> to vector<2048x256xbf16>
    %cst_6 = arith.constant dense<0.000000e+00> : vector<2x256xf32>
    %11 = tpu.matmul %8, %10, %cst_6 {dimension_numbers = #tpu.dot_dimension_numbers<[1], [0], [0], [1], [0, 0, 1, 1], [], []>} : vector<2x2048xbf16>, vector<2048x256xbf16>, vector<2x256xf32> -> vector<2x256xf32>
    %c0_7 = arith.constant 0 : index
    %c0_8 = arith.constant 0 : index
    %c0_9 = arith.constant 0 : index
    %12 = vector.load %arg4[%c0_7, %c0_8, %c0_9] : memref<1x1x256xf32, #tpu.memory_space<vmem>>, vector<1x1x256xf32>
    %13 = vector.shape_cast %12 : vector<1x1x256xf32> to vector<1x256xf32>
    %14 = vector.broadcast %13 : vector<1x256xf32> to vector<2x256xf32>
    %15 = arith.addf %11, %14 : vector<2x256xf32>
    %cst_10 = arith.constant 0.000000e+00 : f32
    %16 = vector.broadcast %cst_10 : f32 to vector<2x256xf32>
    %17 = arith.maximumf %15, %16 : vector<2x256xf32>
    %18 = arith.truncf %17 : vector<2x256xf32> to vector<2x256xbf16>
    %c0_11 = arith.constant 0 : index
    %c0_12 = arith.constant 0 : index
    %c0_13 = arith.constant 0 : index
    %19 = vector.load %arg5[%c0_11, %c0_12, %c0_13] : memref<1x256x128xbf16, #tpu.memory_space<vmem>>, vector<1x256x128xbf16>
    %20 = vector.shape_cast %19 : vector<1x256x128xbf16> to vector<256x128xbf16>
    %cst_14 = arith.constant dense<0.000000e+00> : vector<2x128xf32>
    %21 = tpu.matmul %18, %20, %cst_14 {dimension_numbers = #tpu.dot_dimension_numbers<[1], [0], [0], [1], [0, 0, 1, 1], [], []>} : vector<2x256xbf16>, vector<256x128xbf16>, vector<2x128xf32> -> vector<2x128xf32>
    %c0_15 = arith.constant 0 : index
    %c0_16 = arith.constant 0 : index
    %c0_17 = arith.constant 0 : index
    %22 = vector.load %arg6[%c0_15, %c0_16, %c0_17] : memref<1x1x128xf32, #tpu.memory_space<vmem>>, vector<1x1x128xf32>
    %23 = vector.shape_cast %22 : vector<1x1x128xf32> to vector<1x128xf32>
    %24 = vector.broadcast %23 : vector<1x128xf32> to vector<2x128xf32>
    %25 = arith.addf %21, %24 : vector<2x128xf32>
    %c0_18 = arith.constant 0 : index
    %c0_19 = arith.constant 0 : index
    %c0_20 = arith.constant 0 : index
    %26 = vector.load %arg7[%c0_18, %c0_19, %c0_20] : memref<1x2x128xf32, #tpu.memory_space<vmem>>, vector<1x2x128xf32>
    %27 = vector.shape_cast %26 : vector<1x2x128xf32> to vector<2x128xf32>
    %28 = vector.shape_cast %25 : vector<2x128xf32> to vector<1x2x128xf32>
    tpu.vector_store %arg7[%c0_18, %c0_19, %c0_20], %28 {strides = array<i32>} : memref<1x2x128xf32, #tpu.memory_space<vmem>>, vector<1x2x128xf32>,
    return
  }
  func.func @transform_0(%arg0: i32, %arg1: i32) -> (i32, i32, i32, i32) {
    %c0_i32 = arith.constant 0 : i32
    %c0_i32_0 = arith.constant 0 : i32
    %c0_i32_1 = arith.constant 0 : i32
    return %arg1, %arg0, %c0_i32, %c0_i32_0 : i32, i32, i32, i32
  }
  func.func @transform_1(%arg0: i32, %arg1: i32) -> (i32, i32, i32) {
    %c0_i32 = arith.constant 0 : i32
    %c0_i32_0 = arith.constant 0 : i32
    %c0_i32_1 = arith.constant 0 : i32
    return %arg0, %c0_i32, %c0_i32_0 : i32, i32, i32
  }
  func.func @transform_2(%arg0: i32, %arg1: i32) -> (i32, i32, i32) {
    %c0_i32 = arith.constant 0 : i32
    %c0_i32_0 = arith.constant 0 : i32
    %c0_i32_1 = arith.constant 0 : i32
    return %arg0, %c0_i32, %c0_i32_0 : i32, i32, i32
  }
  func.func @transform_3(%arg0: i32, %arg1: i32) -> (i32, i32, i32) {
    %c0_i32 = arith.constant 0 : i32
    %c0_i32_0 = arith.constant 0 : i32
    %c0_i32_1 = arith.constant 0 : i32
    return %arg0, %c0_i32, %c0_i32_0 : i32, i32, i32
  }
  func.func @transform_4(%arg0: i32, %arg1: i32) -> (i32, i32, i32) {
    %c0_i32 = arith.constant 0 : i32
    %c0_i32_0 = arith.constant 0 : i32
    %c0_i32_1 = arith.constant 0 : i32
    return %arg0, %c0_i32, %c0_i32_0 : i32, i32, i32
  }
  func.func @transform_5(%arg0: i32, %arg1: i32) -> (i32, i32, i32) {
    %c0_i32 = arith.constant 0 : i32
    %c0_i32_0 = arith.constant 0 : i32
    return %arg0, %arg1, %c0_i32 : i32, i32, i32
  }
}

</mosaic_0001>

<bundles_post_ra>
// kernel: tpu_custom_call.1
= control target key start
LH: loop header
LB: loop body
LE: loop exit
PB: predicated region body
PF: predicated region fallthrough
CT: control target
= control target key end

     0   :  { %s6401_s0 = inlined_call_operand.hbm [shape: f32[2,4,8,2048], index: 0, kind: input, shape index: {}]   ;;  %s6402_s1 = inlined_call_operand.hbm [shape: bf16[4,2048,256], index: 1, kind: input, shape index: {}]   ;;  %s6403_s2 = inlined_call_operand.hbm [shape: f32[4,1,256], index: 2, kind: input, shape index: {}]   ;;  %s6404_s3 = inlined_call_operand.hbm [shape: bf16[4,256,128], index: 3, kind: input, shape index: {}]   ;;  %s6405_s4 = inlined_call_operand.hbm [shape: f32[4,1,128], index: 4, kind: input, shape index: {}]   ;;  %s6406_s5 = inlined_call_operand.hbm [shape: f32[4,2,128], index: 5, kind: output, shape index: {}]  }
   0x1   :  { %6425 = sst [smem:[#allocation32_spill]] %s6401_s0 }
   0x2   :  { %6426 = sst [smem:[#allocation33_spill]] %s6402_s1 }
   0x3   :  { %6427 = sst [smem:[#allocation34_spill]] %s6404_s3 }
   0x4   :  { %6428 = sst [smem:[#allocation35_spill]] %s6406_s5 }
   0x5   :  { %10 = vsyncpa [#allocation3], 0 }
   0x6   :  { %12 = vsyncpa [#allocation3 + $0x1], 0 }
   0x7   :  { %13 = vsyncpa [#allocation6], 0 }
   0x8   :  { %15 = vsyncpa [#allocation6 + $0x1], 0 }
   0x9   :  { %16 = vsyncpa [#allocation9], 0 }
   0xa   :  { %18 = vsyncpa [#allocation9 + $0x1], 0 }
   0xb   :  { %19 = vsyncpa [#allocation4], 0 }
   0xc   :  { %21 = vsyncpa [#allocation4 + $0x1], 0  ;;  %s4878_s18 = smov 0   ;;  %s4880_s19 = smov 0  }
   0xd   :  { %s4882_s20 = smov 0   ;;  %s4884_s21 = smov 0  }
   0xe   :  { %s4886_s22 = smov 0   ;;  %s4888_s23 = smov 0  }
   0xf LB: > { %6429 = sst [smem:[#allocation16_spill]] %s4820_s18  ;;  %s4909_s24 = sadd.s32 4294967295, %s4840_s23   ;;  %s4840_s23 = sphi %s4888_s23, %s27_s23   ;;  %s4836_s22 = sphi %s4886_s22, %s6491_s22   ;;  %s4832_s21 = sphi %s4884_s21, %s6490_s21   ;;  %s4828_s20 = sphi %s4882_s20, %s6486_s20   ;;  %s4824_s19 = sphi %s4880_s19, %s6489_s19   ;;  %s4820_s18 = sphi %s4878_s18, %s6488_s18  }
  0x10   : > { %6430 = sst [smem:[#allocation17_spill]] %s4828_s20  ;;  %s3124_s25 = sadd.s32 4294967294, %s4840_s23  }
  0x11   : > { %6431 = sst [smem:[#allocation18_spill]] %s4832_s21  ;;  %s39_s26 = sadd.s32 1, %s4836_s22 }
  0x12   : > { %6432 = sst [smem:[#allocation19_spill]] %s4840_s23  ;;  %s48_s27 = sadd.s32 1, %s4828_s20 }
  0x13   : > { %p41_p0 = scmp.ge.s32.totalorder %s39_s26, 4  ;;  %p55_p1 = scmp.ne.s32.totalorder %s4828_s20, %s4824_s19 }
  0x14   : > { %p56_p2 = scmp.eq.s32.totalorder %s4840_s23, 0  ;;  %p61_p3 = scmp.ne.s32.totalorder %s4824_s19, %s4820_s18 }
  0x15   : > { %s6493_s26 = smov (%p41_p0, %s39_s26), 0  ;;  %p62_p5 = scmp.eq.s32.totalorder %s4909_s24, 0 }
  0x16   : > { %6433 = sst [smem:[#allocation20_spill]] %s6493_s26  ;;  %p4921_p4 = por %p56_p2, %p55_p1 }
  0x17   : > { %s44_s29 = ssub.s32 %s4836_s22, %s6493_s26  ;;  %p191_p6 = scmp.eq.s32.totalorder %s4909_s24, 3 }
  0x18   : > { %p46_p7 = scmp.eq.s32.totalorder %s44_s29, 0  ;;  %p4929_p8 = por %p62_p5, %p61_p3 }
  0x19   : > { %p4933_p9 = por %p191_p6, %p55_p1  ;;  %p197_p10 = scmp.eq.s32.totalorder %s3124_s25, 3 }
  0x1a   : > { %s4938_s7 = scalar_select %p46_p7, %s4828_s20, %s48_s27  }
  0x1b   : > { %s6436_s6 = scalar_select %p4933_p9, 1, 0 }
  0x1c   : > { %6438 = sst [smem:[#allocation22_spill]] %s4938_s7  ;;  %p4940_p11 = por %p197_p10, %p61_p3 }
  0x1d   : > { %6437 = sst [smem:[#allocation21_spill]] %s6436_s6  ;;  %p4543_p12 = scmp.lt.s32.totalorder %s4840_s23, 4 }
  0x1e   : > { %s6439_s8 = scalar_select %p4940_p11, 1, 0 }
  0x1f   : > { %s4946_s9 = sand.u32 1, %s4828_s20   ;;  %s242_s10 = sand.u32 1, %s4840_s23  }
  0x20   : > { %6440 = sst [smem:[#allocation23_spill]] %s6439_s8  ;;  %p4951_p13 = pnand %p4543_p12, %p4921_p4 }
  0x21   : > { %s3130_s12 = sshll.u32 %s4946_s9, 11  ;;  %s4237_s13 = sshll.u32 %s4836_s22, 11 }
  0x22   : > { %s6442_s1 = sld [smem:[#allocation33_spill]]  ;;  %s246_s17 = scalar_lea.vmem [#allocation5], %s3130_s12 }
  0x23   : > { %s254_s25 = sshll.u32 %s246_s17, 4  ;;  %s4960_s29 = scalar_lea.sflag [#allocation6], %s242_s10  ;;  %s255_s25 = int_to_ptr.vmem [resolvable:$true] %s254_s25 }
  0x24   : > { %s6409_s28 = smov 128   ;;  %s4843_s26 = smov 8  }
  0x25   : > { %p3138_p0 = scmp.ge.s32.totalorder %s4840_s23, 1  ;;  %p320_p1 = scmp.lt.s32.totalorder %s4840_s23, 5 }
  0x26   : > { %s4236_s14 = sshll.u32 %s4836_s22, 7  ;;  %s6444_s0 = sld [smem:[#allocation32_spill]] }
  0x27   : > { %p4970_p2 = pnand %p3138_p0, %p320_p1  ;;  %s6445_s3 = sld [smem:[#allocation34_spill]] }
  0x28   : > { %s251_s16 = scalar_lea.hbm %s6442_s1, %s4237_s13  ;;  %s3135_s1 = sshll.u32 %s4946_s9, 7 }
  0x29   : > { %s252_s27 = sshll.u32 %s251_s16, 4  ;;  %s284_s8 = scalar_lea.sflag [#allocation9], %s242_s10  ;;  %s253_s27 = int_to_ptr.hbm [resolvable:$true] %s252_s27 }
  0x2a   : > { %4529 = dma.hbm_to_vmem [thread:$0]  (!%p4951_p13), %s253_s27, 32768, %s255_s25, %s4960_s29, %s6409_s28, %s6409_s28, %s4843_s26  }
  0x2b   : > { %s287_s25 = scalar_lea.vmem [#allocation8], %s3135_s1  ;;  %s4844_s18 = smov 64  }
  0x2c   : > { %s229_s16 = scalar_lea.hbm %s6444_s0, %s4236_s14  ;;  %s295_s27 = sshll.u32 %s287_s25, 4  ;;  %s296_s27 = int_to_ptr.vmem [resolvable:$true] %s295_s27 }
  0x2d   : > { %s230_s17 = sshll.u32 %s229_s16, 4  ;;  %s292_s26 = scalar_lea.hbm %s6445_s3, %s4236_s14  ;;  %s231_s17 = int_to_ptr.hbm [resolvable:$true] %s230_s17 }
  0x2e   : > { %s293_s28 = sshll.u32 %s292_s26, 4  ;;  %s4845_s13 = smov 4   ;;  %s294_s28 = int_to_ptr.hbm [resolvable:$true] %s293_s28 }
  0x2f   : > { %4535 = dma.hbm_to_vmem [thread:$0]  (!%p4951_p13), %s294_s28, 2048, %s296_s27, %s284_s8, %s4844_s18, %s4844_s18, %s4845_s13  }
  0x30   : > { %s3127_s15 = sshll.u32 %s4946_s9, 8  ;;  %s3133_s7 = sshll.u32 %s4946_s9, 1 }
  0x31   : > { %s221_s16 = scalar_lea.vmem [#allocation2], %s3127_s15  ;;  %s218_s1 = scalar_lea.sflag [#allocation3], %s4946_s9 }
  0x32   : > { %s232_s20 = sshll.u32 %s221_s16, 4  ;;  %s4846_s14 = smov 8192   ;;  %s233_s20 = int_to_ptr.vmem [resolvable:$true] %s232_s20 }
  0x33   : > { %s4847_s26 = smov 2048   ;;  %s6446_s25 = smov 128  }
  0x34   : > { %4526 = dma.hbm_to_vmem [thread:$0]  (!%p4951_p13), %s231_s17, 4096, %s233_s20, %s218_s1, %s4846_s14, %s4847_s26, %s6446_s25  }
  0x35   : > { %s3134_s10 = sshll.u32 %s4836_s22, 1  ;;  %s268_s0 = scalar_lea.vmem [#allocation7], %s3133_s7 }
  0x36   : > { %s276_s3 = sshll.u32 %s268_s0, 4  ;;  %s272_s27 = scalar_lea.hbm %s6403_s2, %s3134_s10  ;;  %s277_s3 = int_to_ptr.vmem [resolvable:$true] %s276_s3 }
  0x37   : > { %s274_s13 = sshll.u32 %s272_s27, 4  ;;  %s311_s23 = scalar_lea.hbm %s6405_s4, %s4836_s22  ;;  %s275_s13 = int_to_ptr.hbm [resolvable:$true] %s274_s13 }
  0x38   : > { %4532 = dma.hbm_to_vmem [thread:$0]  (!%p4951_p13), %s275_s13, 32, %s277_s3, %s4960_s29  }
  0x39   : > { %s313_s6 = sshll.u32 %s311_s23, 4  ;;  %s308_s5 = scalar_lea.vmem [#allocation10], %s4946_s9  ;;  %s314_s6 = int_to_ptr.hbm [resolvable:$true] %s313_s6 }
  0x3a   : > { %s315_s21 = sshll.u32 %s308_s5, 4  ;;  %324 = sbr.rel (%p4970_p2) target bundleno = 616 (0x268), region = 40  ;;  %s316_s21 = int_to_ptr.vmem [resolvable:$true] %s315_s21 }
  0x3b   : > { %4538 = dma.hbm_to_vmem [thread:$0]  (!%p4951_p13), %s314_s6, 16, %s316_s21, %s284_s8  }
  0x3f   : > { %s5006_s0 = sand.u32 1, %s4824_s19  }
  0x40   : > { %s3139_s17 = sshll.u32 %s5006_s0, 8  ;;  %s327_s20 = scalar_lea.sflag [#allocation3], %s5006_s0 }
  0x41   : > { %s5010_s7 = scalar_lea.vmem [#allocation2], %s3139_s17 }
  0x42   : > { %4803 = dma.done.wait (%p4929_p8), %s327_s20, 4096  }
  0x43   : > { %4805 = vsyncadd (%p4929_p8), %s327_s20, 4294963200  ;;  %s336_s3 = sand.u32 1, %s4909_s24   ;;  %s3140_s5 = sshll.u32 %s5006_s0, 11 }
  0x44   : > { %s337_s21 = scalar_lea.sflag [#allocation6], %s336_s3  ;;  %s5018_s23 = scalar_lea.vmem [#allocation5], %s3140_s5 }
  0x45   : > { %4807 = dma.done.wait (%p4929_p8), %s337_s21, 32800  }
  0x46   : > { %4809 = vsyncadd (%p4929_p8), %s337_s21, 4294934496  ;;  %s3141_s6 = sshll.u32 %s5006_s0, 1  ;;  %s3142_s8 = sshll.u32 %s5006_s0, 7 }
  0x47   : > { %s5028_s9 = scalar_lea.vmem [#allocation7], %s3141_s6  ;;  %s357_s11 = scalar_lea.sflag [#allocation9], %s336_s3 }
  0x48   : > { %s5030_s24 = scalar_lea.vmem [#allocation8], %s3142_s8 }
  0x49   : > { %4811 = dma.done.wait (%p4929_p8), %s357_s11, 2064  }
  0x4a   : > { %4813 = vsyncadd (%p4929_p8), %s357_s11, 4294965232  ;;  %v3202_v0 = vld [vmem:[%s5018_s23 + $0x70] sm:$0xf]  ;;  %v4254_v1 = vld [vmem:[%s5018_s23 + $0x74] sm:$0xf0]  ;;  %vm1034_vm0 = vcmask 1041409  }
  0x4b   : > { %v3266_v2 = vld [vmem:[%s5018_s23 + $0xf0] sm:$0xf]  ;;  %v3203_v3 = vor.u32 %v4254_v1, %v3202_v0  ;;  %v4270_v4 = vld [vmem:[%s5018_s23 + $0xf4] sm:$0xf0]  ;;  %v3194_v11 = vld [vmem:[%s5018_s23 + $0x60] sm:$0xf] }
  0x4c   : > { %v3330_v5 = vld [vmem:[%s5018_s23 + $0x170] sm:$0xf]  ;;  %v4286_v6 = vld [vmem:[%s5018_s23 + $0x174] sm:$0xf0]  ;;  %v3267_v7 = vor.u32 %v4270_v4, %v3266_v2  ;;  %v4252_v13 = vld [vmem:[%s5018_s23 + $0x64] sm:$0xf0] }
  0x4d   : > { %v3331_v8 = vor.u32 %v4286_v6, %v3330_v5  ;;  %v3394_v9 = vld [vmem:[%s5018_s23 + $0x1f0] sm:$0xf]  ;;  %v4302_v10 = vld [vmem:[%s5018_s23 + $0x1f4] sm:$0xf0]  ;;  %2363 = vmatpush.bf16.msra.mxu0 %v3203_v3  ;;  %v3258_v14 = vld [vmem:[%s5018_s23 + $0xe0] sm:$0xf]  ;;  %v3195_v16 = vor.u32 %v4252_v13, %v3194_v11 }
  0x4e   : > { %v3395_v12 = vor.u32 %v4302_v10, %v3394_v9  ;;  %v4268_v15 = vld [vmem:[%s5018_s23 + $0xe4] sm:$0xf0]  ;;  %2376 = vmatpush.bf16.msra.mxu1 %v3267_v7  ;;  %v3322_v18 = vld [vmem:[%s5018_s23 + $0x160] sm:$0xf]  ;;  %v3186_v23 = vld [vmem:[%s5018_s23 + $0x50] sm:$0xf] }
  0x4f   : > { %2389 = vmatpush.bf16.msra.mxu2 %v3331_v8  ;;  %v3259_v17 = vor.u32 %v4268_v15, %v3258_v14  ;;  %v4284_v19 = vld [vmem:[%s5018_s23 + $0x164] sm:$0xf0]  ;;  %v3386_v20 = vld [vmem:[%s5018_s23 + $0x1e0] sm:$0xf]  ;;  %v4250_v24 = vld [vmem:[%s5018_s23 + $0x54] sm:$0xf0] }
  0x50   : > { %2402 = vmatpush.bf16.msra.mxu3 %v3395_v12  ;;  %v3323_v21 = vor.u32 %v4284_v19, %v3322_v18  ;;  %v4300_v22 = vld [vmem:[%s5018_s23 + $0x1e4] sm:$0xf0]  ;;  %v3250_v26 = vld [vmem:[%s5018_s23 + $0xd0] sm:$0xf]  ;;  %v4266_v27 = vld [vmem:[%s5018_s23 + $0xd4] sm:$0xf0]  ;;  %v3187_v29 = vor.u32 %v4250_v24, %v3186_v23 }
  0x51   : > { %v3387_v25 = vor.u32 %v4300_v22, %v3386_v20  ;;  %v3314_v28 = vld [vmem:[%s5018_s23 + $0x150] sm:$0xf]  ;;  %2364 = vmatpush.bf16.msra.mxu0 %v3195_v16  ;;  %v4282_v30 = vld [vmem:[%s5018_s23 + $0x154] sm:$0xf0]  ;;  %v3251_v33 = vor.u32 %v4266_v27, %v3250_v26  ;;  %v3178_v35 = vld [vmem:[%s5018_s23 + $0x40] sm:$0xf] }
  0x52   : > { %v3378_v31 = vld [vmem:[%s5018_s23 + $0x1d0] sm:$0xf]  ;;  %v4298_v32 = vld [vmem:[%s5018_s23 + $0x1d4] sm:$0xf0]  ;;  %2377 = vmatpush.bf16.msra.mxu1 %v3259_v17  ;;  %v3315_v34 = vor.u32 %v4282_v30, %v3314_v28  ;;  %v4248_v36 = vld [vmem:[%s5018_s23 + $0x44] sm:$0xf0] }
  0x53   : > { %2390 = vmatpush.bf16.msra.mxu2 %v3323_v21  ;;  %v3242_v37 = vld [vmem:[%s5018_s23 + $0xc0] sm:$0xf]  ;;  %v3379_v38 = vor.u32 %v4298_v32, %v3378_v31  ;;  %v4264_v39 = vld [vmem:[%s5018_s23 + $0xc4] sm:$0xf0]  ;;  %v3179_v44 = vor.u32 %v4248_v36, %v3178_v35  ;;  %v3170_v47 = vld [vmem:[%s5018_s23 + $0x30] sm:$0xf] }
  0x54   : > { %2403 = vmatpush.bf16.msra.mxu3 %v3387_v25  ;;  %v3306_v40 = vld [vmem:[%s5018_s23 + $0x140] sm:$0xf]  ;;  %v4280_v41 = vld [vmem:[%s5018_s23 + $0x144] sm:$0xf0]  ;;  %v3243_v45 = vor.u32 %v4264_v39, %v3242_v37  ;;  %v4246_v48 = vld [vmem:[%s5018_s23 + $0x34] sm:$0xf0] }
  0x55   : > { %v3370_v42 = vld [vmem:[%s5018_s23 + $0x1c0] sm:$0xf]  ;;  %v4296_v43 = vld [vmem:[%s5018_s23 + $0x1c4] sm:$0xf0]  ;;  %2365 = vmatpush.bf16.msra.mxu0 %v3187_v29  ;;  %v3307_v46 = vor.u32 %v4280_v41, %v3306_v40  ;;  %v3234_v49 = vld [vmem:[%s5018_s23 + $0xb0] sm:$0xf]  ;;  %v3171_v56 = vor.u32 %v4246_v48, %v3170_v47 }
  0x56   : > { %2378 = vmatpush.bf16.msra.mxu1 %v3251_v33  ;;  %v3371_v50 = vor.u32 %v4296_v43, %v3370_v42  ;;  %v4262_v51 = vld [vmem:[%s5018_s23 + $0xb4] sm:$0xf0]  ;;  %v3298_v52 = vld [vmem:[%s5018_s23 + $0x130] sm:$0xf]  ;;  %v3162_v59 = vld [vmem:[%s5018_s23 + $0x20] sm:$0xf] }
  0x57   : > { %2391 = vmatpush.bf16.msra.mxu2 %v3315_v34  ;;  %v4278_v53 = vld [vmem:[%s5018_s23 + $0x134] sm:$0xf0]  ;;  %v3362_v54 = vld [vmem:[%s5018_s23 + $0x1b0] sm:$0xf]  ;;  %v3235_v57 = vor.u32 %v4262_v51, %v3234_v49  ;;  %v4244_v60 = vld [vmem:[%s5018_s23 + $0x24] sm:$0xf0] }
  0x58   : > { %2404 = vmatpush.bf16.msra.mxu3 %v3379_v38  ;;  %v4294_v55 = vld [vmem:[%s5018_s23 + $0x1b4] sm:$0xf0]  ;;  %v3299_v58 = vor.u32 %v4278_v53, %v3298_v52  ;;  %v3226_v61 = vld [vmem:[%s5018_s23 + $0xa0] sm:$0xf]  ;;  %v4260_v63 = vld [vmem:[%s5018_s23 + $0xa4] sm:$0xf0]  ;;  %v3163_v4 = vor.u32 %v4244_v60, %v3162_v59 }
  0x59   : > { %2366 = vmatpush.bf16.msra.mxu0 %v3179_v44  ;;  %v3363_v62 = vor.u32 %v4294_v55, %v3362_v54  ;;  %v3290_v0 = vld [vmem:[%s5018_s23 + $0x120] sm:$0xf]  ;;  %v4276_v1 = vld [vmem:[%s5018_s23 + $0x124] sm:$0xf0]  ;;  %v3227_v5 = vor.u32 %v4260_v63, %v3226_v61  ;;  %v3154_v7 = vld [vmem:[%s5018_s23 + $0x10] sm:$0xf] }
  0x5a   : > { %2379 = vmatpush.bf16.msra.mxu1 %v3243_v45  ;;  %v3354_v2 = vld [vmem:[%s5018_s23 + $0x1a0] sm:$0xf]  ;;  %v4292_v3 = vld [vmem:[%s5018_s23 + $0x1a4] sm:$0xf0]  ;;  %v3291_v6 = vor.u32 %v4276_v1, %v3290_v0  ;;  %v4242_v8 = vld [vmem:[%s5018_s23 + $0x14] sm:$0xf0] }
  0x5b   : > { %2392 = vmatpush.bf16.msra.mxu2 %v3307_v46  ;;  %v3218_v9 = vld [vmem:[%s5018_s23 + $0x90] sm:$0xf]  ;;  %v3355_v10 = vor.u32 %v4292_v3, %v3354_v2  ;;  %v4258_v11 = vld [vmem:[%s5018_s23 + $0x94] sm:$0xf0]  ;;  %v3155_v16 = vor.u32 %v4242_v8, %v3154_v7  ;;  %v3146_v17 = vld [vmem:[%s5018_s23] sm:$0xf] }
  0x5c   : > { %2405 = vmatpush.bf16.msra.mxu3 %v3371_v50  ;;  %v3282_v12 = vld [vmem:[%s5018_s23 + $0x110] sm:$0xf]  ;;  %v4274_v13 = vld [vmem:[%s5018_s23 + $0x114] sm:$0xf0]  ;;  %v4240_v18 = vld [vmem:[%s5018_s23 + $0x4] sm:$0xf0]  ;;  %v3219_v20 = vor.u32 %v4258_v11, %v3218_v9 }
  0x5d   : > { %2367 = vmatpush.bf16.msra.mxu0 %v3171_v56  ;;  %v3346_v14 = vld [vmem:[%s5018_s23 + $0x190] sm:$0xf]  ;;  %v4290_v15 = vld [vmem:[%s5018_s23 + $0x194] sm:$0xf0]  ;;  %v3210_v19 = vld [vmem:[%s5018_s23 + $0x80] sm:$0xf]  ;;  %v3283_v21 = vor.u32 %v4274_v13, %v3282_v12  ;;  %v3147_v32 = vor.u32 %v4240_v18, %v3146_v17 }
  0x5e   : > { %2380 = vmatpush.bf16.msra.mxu1 %v3235_v57  ;;  %v4256_v22 = vld [vmem:[%s5018_s23 + $0x84] sm:$0xf0]  ;;  %v3274_v23 = vld [vmem:[%s5018_s23 + $0x100] sm:$0xf]  ;;  %v3347_v25 = vor.u32 %v4290_v15, %v3346_v14  ;;  %v3458_v28 = vld [vmem:[%s5018_s23 + $0x270] sm:$0xf] }
  0x5f   : > { %2393 = vmatpush.bf16.msra.mxu2 %v3299_v58  ;;  %v4272_v24 = vld [vmem:[%s5018_s23 + $0x104] sm:$0xf0]  ;;  %v3338_v26 = vld [vmem:[%s5018_s23 + $0x180] sm:$0xf]  ;;  %v4318_v29 = vld [vmem:[%s5018_s23 + $0x274] sm:$0xf0]  ;;  %v3211_v36 = vor.u32 %v4256_v22, %v3210_v19 }
  0x60   : > { %2406 = vmatpush.bf16.msra.mxu3 %v3363_v62  ;;  %v4288_v27 = vld [vmem:[%s5018_s23 + $0x184] sm:$0xf0]  ;;  %v3522_v30 = vld [vmem:[%s5018_s23 + $0x2f0] sm:$0xf]  ;;  %v4334_v31 = vld [vmem:[%s5018_s23 + $0x2f4] sm:$0xf0]  ;;  %v3275_v37 = vor.u32 %v4272_v24, %v3274_v23  ;;  %v3459_v42 = vor.u32 %v4318_v29, %v3458_v28 }
  0x61   : > { %2368 = vmatpush.bf16.msra.mxu0 %v3163_v4  ;;  %v3586_v33 = vld [vmem:[%s5018_s23 + $0x370] sm:$0xf]  ;;  %v4350_v34 = vld [vmem:[%s5018_s23 + $0x374] sm:$0xf0]  ;;  %v5109_v39 = vld [vmem:[%s5018_s23 + $0x260] sm:$0xf]  ;;  %v3339_v41 = vor.u32 %v4288_v27, %v3338_v26  ;;  %v3523_v49 = vor.u32 %v4334_v31, %v3522_v30 }
  0x62   : > { %2381 = vmatpush.bf16.msra.mxu1 %v3227_v5  ;;  %v3650_v35 = vld [vmem:[%s5018_s23 + $0x3f0] sm:$0xf]  ;;  %v4366_v38 = vld [vmem:[%s5018_s23 + $0x3f4] sm:$0xf0]  ;;  %v5112_v40 = vld [vmem:[%s5018_s23 + $0x264] sm:$0xf0]  ;;  %v3587_v50 = vor.u32 %v4350_v34, %v3586_v33 }
  0x63   : > { %2394 = vmatpush.bf16.msra.mxu2 %v3291_v6  ;;  %v5115_v43 = vld [vmem:[%s5018_s23 + $0x2e0] sm:$0xf]  ;;  %v5118_v44 = vld [vmem:[%s5018_s23 + $0x2e4] sm:$0xf0]  ;;  %v5133_v51 = vld [vmem:[%s5018_s23 + $0x250] sm:$0xf]  ;;  %v3651_v59 = vor.u32 %v4366_v38, %v3650_v35  ;;  %v3451_v7 = vor.u32 %v5112_v40, %v5109_v39 }
  0x64   : > { %2407 = vmatpush.bf16.msra.mxu3 %v3355_v10  ;;  %v5121_v45 = vld [vmem:[%s5018_s23 + $0x360] sm:$0xf]  ;;  %v5124_v46 = vld [vmem:[%s5018_s23 + $0x364] sm:$0xf0]  ;;  %v5136_v52 = vld [vmem:[%s5018_s23 + $0x254] sm:$0xf0]  ;;  %v3515_v11 = vor.u32 %v5118_v44, %v5115_v43 }
  0x65   : > { %2369 = vmatpush.bf16.msra.mxu0 %v3155_v16  ;;  %v5127_v47 = vld [vmem:[%s5018_s23 + $0x3e0] sm:$0xf]  ;;  %v5130_v48 = vld [vmem:[%s5018_s23 + $0x3e4] sm:$0xf0]  ;;  %v5139_v53 = vld [vmem:[%s5018_s23 + $0x2d0] sm:$0xf]  ;;  %v3579_v12 = vor.u32 %v5124_v46, %v5121_v45  ;;  %v3443_v17 = vor.u32 %v5136_v52, %v5133_v51 }
  0x66   : > { %2382 = vmatpush.bf16.msra.mxu1 %v3219_v20  ;;  %v5142_v54 = vld [vmem:[%s5018_s23 + $0x2d4] sm:$0xf0]  ;;  %v5145_v55 = vld [vmem:[%s5018_s23 + $0x350] sm:$0xf]  ;;  %v5157_v60 = vld [vmem:[%s5018_s23 + $0x240] sm:$0xf]  ;;  %v3643_v13 = vor.u32 %v5130_v48, %v5127_v47 }
  0x67   : > { %2395 = vmatpush.bf16.msra.mxu2 %v3283_v21  ;;  %v5148_v56 = vld [vmem:[%s5018_s23 + $0x354] sm:$0xf0]  ;;  %v5151_v57 = vld [vmem:[%s5018_s23 + $0x3d0] sm:$0xf]  ;;  %v5160_v61 = vld [vmem:[%s5018_s23 + $0x244] sm:$0xf0]  ;;  %v3507_v18 = vor.u32 %v5142_v54, %v5139_v53 }
  0x68   : > { %2408 = vmatpush.bf16.msra.mxu3 %v3347_v25  ;;  %v5154_v58 = vld [vmem:[%s5018_s23 + $0x3d4] sm:$0xf0]  ;;  %v5163_v62 = vld [vmem:[%s5018_s23 + $0x2c0] sm:$0xf]  ;;  %v5166_v63 = vld [vmem:[%s5018_s23 + $0x2c4] sm:$0xf0]  ;;  %v3571_v19 = vor.u32 %v5148_v56, %v5145_v55  ;;  %v3435_v24 = vor.u32 %v5160_v61, %v5157_v60 }
  0x69   : > { %2370 = vmatpush.bf16.msra.mxu0 %v3147_v32  ;;  %v5169_v0 = vld [vmem:[%s5018_s23 + $0x340] sm:$0xf]  ;;  %v5172_v1 = vld [vmem:[%s5018_s23 + $0x344] sm:$0xf0]  ;;  %v5181_v4 = vld [vmem:[%s5018_s23 + $0x230] sm:$0xf]  ;;  %v3635_v20 = vor.u32 %v5154_v58, %v5151_v57  ;;  %v3499_v25 = vor.u32 %v5166_v63, %v5163_v62 }
  0x6a   : > { %v5175_v2 = vld [vmem:[%s5018_s23 + $0x3c0] sm:$0xf]  ;;  %v5178_v3 = vld [vmem:[%s5018_s23 + $0x3c4] sm:$0xf0]  ;;  %2383 = vmatpush.bf16.msra.mxu1 %v3211_v36  ;;  %v5184_v5 = vld [vmem:[%s5018_s23 + $0x234] sm:$0xf0]  ;;  %v3563_v26 = vor.u32 %v5172_v1, %v5169_v0 }
  0x6b   : > { %2396 = vmatpush.bf16.msra.mxu2 %v3275_v37  ;;  %v5187_v6 = vld [vmem:[%s5018_s23 + $0x2b0] sm:$0xf]  ;;  %v5192_v8 = vld [vmem:[%s5018_s23 + $0x2b4] sm:$0xf0]  ;;  %v5213_v16 = vld [vmem:[%s5018_s23 + $0x220] sm:$0xf]  ;;  %v3627_v27 = vor.u32 %v5178_v3, %v5175_v2  ;;  %v3427_v31 = vor.u32 %v5184_v5, %v5181_v4 }
  0x6c   : > { %2409 = vmatpush.bf16.msra.mxu3 %v3339_v41  ;;  %v5195_v9 = vld [vmem:[%s5018_s23 + $0x330] sm:$0xf]  ;;  %v5198_v10 = vld [vmem:[%s5018_s23 + $0x334] sm:$0xf0]  ;;  %v5224_v21 = vld [vmem:[%s5018_s23 + $0x224] sm:$0xf0]  ;;  %v3491_v32 = vor.u32 %v5192_v8, %v5187_v6 }
  0x6d   : > { %2415 = vmatpush.bf16.msrb.mxu0 %v3459_v42  ;;  %v5207_v14 = vld [vmem:[%s5018_s23 + $0x3b0] sm:$0xf]  ;;  %v5210_v15 = vld [vmem:[%s5018_s23 + $0x3b4] sm:$0xf0]  ;;  %v5227_v22 = vld [vmem:[%s5018_s23 + $0x2a0] sm:$0xf]  ;;  %v3555_v33 = vor.u32 %v5198_v10, %v5195_v9  ;;  %v3419_v38 = vor.u32 %v5224_v21, %v5213_v16 }
  0x6e   : > { %2428 = vmatpush.bf16.msrb.mxu1 %v3523_v49  ;;  %v5230_v23 = vld [vmem:[%s5018_s23 + $0x2a4] sm:$0xf0]  ;;  %v5241_v28 = vld [vmem:[%s5018_s23 + $0x320] sm:$0xf]  ;;  %v3619_v34 = vor.u32 %v5210_v15, %v5207_v14  ;;  %v422_v36 = vld [vmem:[%s5010_s7 + $0x10] sm:$0xff]  ;;  %s369_s30 = scalar_lea.vmem [#allocation10], %s5006_s0 }
  0x6f   : > { %2441 = vmatpush.bf16.msrb.mxu2 %v3587_v50  ;;  %v5244_v29 = vld [vmem:[%s5018_s23 + $0x324] sm:$0xf0]  ;;  %v5247_v30 = vld [vmem:[%s5018_s23 + $0x3a0] sm:$0xf]  ;;  %v438_v37 = vld [vmem:[%s5010_s7 + $0x90] sm:$0xff]  ;;  %v3483_v39 = vor.u32 %v5230_v23, %v5227_v22  ;;  %v464_v40 = vrot.slane %v422_v36, 4 }
  0x70   : > { %2454 = vmatpush.bf16.msrb.mxu3 %v3651_v59  ;;  %v5258_v35 = vld [vmem:[%s5018_s23 + $0x3a4] sm:$0xf0]  ;;  %v560_v41 = vrot.slane %v438_v37, 4  ;;  %v420_v42 = vld [vmem:[%s5010_s7] sm:$0xff]  ;;  %v423_v44 = vld [vmem:[%s5010_s7 + $0x18] sm:$0xff]  ;;  %v6447_v21 = vor.u32 %v5244_v29, %v5241_v28  ;;  %s6479_s29 = sld [smem:[#allocation18_spill]] }
  0x71   : > { %2416 = vmatpush.bf16.msrb.mxu0 %v3451_v7  ;;  %v436_v43 = vld [vmem:[%s5010_s7 + $0x80] sm:$0xff]  ;;  %v452_v46 = vrot.slane %v420_v42, 4  ;;  %v439_v48 = vld [vmem:[%s5010_s7 + $0x98] sm:$0xff]  ;;  %v470_v49 = vrot.slane %v423_v44, 4  ;;  %v5273_v50 = vld [vmem:[%s5018_s23 + $0x210] sm:$0xf]  ;;  %v465_v52 = vadd.f32 %v464_v40, %v422_v36 }
  0x72   : > { %2429 = vmatpush.bf16.msrb.mxu1 %v3515_v11  ;;  %v548_v47 = vrot.slane %v436_v43, 4  ;;  %v561_v53 = vadd.f32 %v560_v41, %v438_v37  ;;  %v566_v54 = vrot.slane %v439_v48, 4  ;;  %v5278_v55 = vld [vmem:[%s5018_s23 + $0x214] sm:$0xf0]  ;;  %v5281_v56 = vld [vmem:[%s5018_s23 + $0x290] sm:$0xf] }
  0x73   : > { %2442 = vmatpush.bf16.msrb.mxu2 %v3579_v12  ;;  %v421_v57 = vld [vmem:[%s5010_s7 + $0x8] sm:$0xff]  ;;  %v453_v58 = vadd.f32 %v452_v46, %v420_v42  ;;  %v471_v7 = vadd.f32 %v470_v49, %v423_v44  ;;  %v5287_v12 = vld [vmem:[%s5018_s23 + $0x294] sm:$0xf0]  ;;  %v466_v37 = vrot.slane %v465_v52, 2  ;;  %v5298_v42 = vld [vmem:[%s5018_s23 + $0x390] sm:$0xf] }
  0x74   : > { %2455 = vmatpush.bf16.msrb.mxu3 %v3643_v13  ;;  %v549_v59 = vadd.f32 %v548_v47, %v436_v43  ;;  %v5290_v13 = vld [vmem:[%s5018_s23 + $0x310] sm:$0xf]  ;;  %v5293_v36 = vld [vmem:[%s5018_s23 + $0x314] sm:$0xf0]  ;;  %v562_v40 = vrot.slane %v561_v53, 2  ;;  %v567_v41 = vadd.f32 %v566_v54, %v439_v48  ;;  %v458_v45 = vrot.slane %v421_v57, 4 }
  0x75   : > { %2417 = vmatpush.bf16.msrb.mxu0 %v3443_v17  ;;  %v5301_v43 = vld [vmem:[%s5018_s23 + $0x394] sm:$0xf0]  ;;  %v454_v44 = vrot.slane %v453_v58, 2  ;;  %v472_v47 = vrot.slane %v471_v7, 2  ;;  %v3539_v49 = vor.u32 %v5293_v36, %v5290_v13  ;;  %v5330_v5 = vld [vmem:[%s5018_s23 + $0x200] sm:$0xf] }
  0x76   : > { %2430 = vmatpush.bf16.msrb.mxu1 %v3507_v18  ;;  %v550_v46 = vrot.slane %v549_v59, 2  ;;  %v437_v18 = vld [vmem:[%s5010_s7 + $0x88] sm:$0xff]  ;;  %v563_v11 = vadd.f32 %v562_v40, %v561_v53  ;;  %v568_v51 = vrot.slane %v567_v41, 2  ;;  %v3603_v48 = vor.u32 %v5301_v43, %v5298_v42  ;;  %v5339_v10 = vld [vmem:[%s5018_s23 + $0x280] sm:$0xf]  ;;  %v5372_v16 = vld [vmem:[%s5010_s7 + $0x30] sm:$0xff] }
  0x77   : > { %2443 = vmatpush.bf16.msrb.mxu2 %v3571_v19  ;;  %v467_v19 = vadd.f32 %v466_v37, %v465_v52  ;;  %v455_v54 = vadd.f32 %v454_v44, %v453_v58  ;;  %v473_v17 = vadd.f32 %v472_v47, %v471_v7  ;;  %v554_v40 = vrot.slane %v437_v18, 4  ;;  %v5348_v15 = vld [vmem:[%s5018_s23 + $0x304] sm:$0xf0]  ;;  %v5390_v22 = vld [vmem:[%s5018_s23 + $0x5f0] sm:$0xf]  ;;  %s4233_s12 = sshll.u32 %s6479_s29, 1 }
  0x78   : > { %2456 = vmatpush.bf16.msrb.mxu3 %v3635_v20  ;;  %v551_v20 = vadd.f32 %v550_v46, %v549_v59  ;;  %v564_v53 = vrot.slane %v563_v11, 1  ;;  %v569_v37 = vadd.f32 %v568_v51, %v567_v41  ;;  %v459_v58 = vadd.f32 %v458_v45, %v421_v57  ;;  %v5345_v51 = vld [vmem:[%s5018_s23 + $0x300] sm:$0xf]  ;;  %v5354_v41 = vld [vmem:[%s5018_s23 + $0x384] sm:$0xf0]  ;;  %s6480_s26 = sld [smem:[#allocation35_spill]] }
  0x79   : > { %2418 = vmatpush.bf16.msrb.mxu0 %v3435_v24  ;;  %v468_v52 = vrot.slane %v467_v19, 1  ;;  %v456_v60 = vrot.slane %v455_v54, 1  ;;  %v474_v24 = vrot.slane %v473_v17, 1  ;;  %v5393_v23 = vld [vmem:[%s5018_s23 + $0x5f4] sm:$0xf0]  ;;  %s415_s18 = scalar_lea.vmem [#allocation11], %s3141_s6 }
  0x7a   : > { %2431 = vmatpush.bf16.msrb.mxu1 %v3499_v25  ;;  %v552_v61 = vrot.slane %v551_v20, 1  ;;  %v565_v62 = vadd.f32 %v564_v53, %v563_v11  ;;  %v570_v63 = vrot.slane %v569_v37, 1  ;;  %v555_v25 = vadd.f32 %v554_v40, %v437_v18  ;;  %v5360_v18 = vld [vmem:[%s5018_s23 + $0x470] sm:$0xf]  ;;  %v5396_v28 = vld [vmem:[%s5018_s23 + $0x460] sm:$0xf] }
  0x7b   : > { %2444 = vmatpush.bf16.msrb.mxu2 %v3563_v26  ;;  %v469_v59 = vadd.f32 %v468_v52, %v467_v19  ;;  %v457_v0 = vadd.f32 %v456_v60, %v455_v54  ;;  %v475_v26 = vadd.f32 %v474_v24, %v473_v17  ;;  %v460_v2 = vrot.slane %v459_v58, 2  ;;  %v5363_v19 = vld [vmem:[%s5018_s23 + $0x474] sm:$0xf0]  ;;  %v5366_v54 = vld [vmem:[%s5018_s23 + $0x4f0] sm:$0xf]  ;;  %s2956_s28 = sshll.u32 %s415_s18, 4  ;;  %s2957_s28 = int_to_ptr.vmem [resolvable:$true] %s2956_s28 }
  0x7c   : > { %2457 = vmatpush.bf16.msrb.mxu3 %v3627_v27  ;;  %v553_v1 = vadd.f32 %v552_v61, %v551_v20  ;;  %v694_v27 = vpack.c.bf16 %v565_v62, %v565_v62  ;;  %v571_v45 = vadd.f32 %v570_v63, %v569_v37  ;;  %v556_v4 = vrot.slane %v555_v25, 2  ;;  %v5369_v20 = vld [vmem:[%s5018_s23 + $0x4f4] sm:$0xf0]  ;;  %v5384_v40 = vld [vmem:[%s5018_s23 + $0x570] sm:$0xf]  ;;  %s2943_s13 = scalar_lea.sflag [#allocation4], %s5006_s0 }
  0x7d   : > { %2419 = vmatpush.bf16.msrb.mxu0 %v3427_v31  ;;  %v678_v3 = vpack.c.bf16 %v469_v59, %v469_v59  ;;  %v5333_v31 = vld [vmem:[%s5018_s23 + $0x204] sm:$0xf0]  ;;  %v676_v6 = vpack.c.bf16 %v457_v0, %v457_v0  ;;  %v461_v9 = vadd.f32 %v460_v2, %v459_v58  ;;  %v5387_v60 = vld [vmem:[%s5018_s23 + $0x574] sm:$0xf0]  ;;  %v6448_v61 = vor.u32 %v5258_v35, %v5247_v30  ;;  %v5411_v63 = vld [vmem:[%s5018_s23 + $0x4e0] sm:$0xf] }
  0x7e   : > { %2432 = vmatpush.bf16.msrb.mxu1 %v3491_v32  ;;  %v692_v8 = vpack.c.bf16 %v553_v1, %v553_v1  ;;  %v679_v32 = vpack.c.bf16 %v475_v26, %v475_v26  ;;  %v1020_v7 = vunpack.c.l.b16 %v694_v27  ;;  %v695_v11 = vpack.c.bf16 %v571_v45, %v571_v45  ;;  %v5399_v29 = vld [vmem:[%s5018_s23 + $0x464] sm:$0xf0]  ;;  %v5417_v0 = vld [vmem:[%s5018_s23 + $0x560] sm:$0xf]  ;;  %v5434_v45 = vld [vmem:[%s5018_s23 + $0x450] sm:$0xf]  ;;  %s2954_s10 = scalar_lea.hbm %s6480_s26, %s4233_s12 }
  0x7f   : > { %2445 = vmatpush.bf16.msrb.mxu2 %v3555_v33  ;;  %v5342_v33 = vld [vmem:[%s5018_s23 + $0x284] sm:$0xf0]  ;;  %v1004_v57 = vunpack.c.l.b16 %v678_v3  ;;  %v557_v14 = vadd.f32 %v556_v4, %v555_v25  ;;  %v1002_v17 = vunpack.c.l.b16 %v676_v6  ;;  %v462_v47 = vrot.slane %v461_v9, 1  ;;  %v5428_v3 = vld [vmem:[%s5018_s23 + $0x5e0] sm:$0xf]  ;;  %s2958_s27 = sshll.u32 %s2954_s10, 4  ;;  %s2959_s27 = int_to_ptr.hbm [resolvable:$true] %s2958_s27 }
  0x80   : > { %2458 = vmatpush.bf16.msrb.mxu3 %v3619_v34  ;;  %v5351_v34 = vld [vmem:[%s5018_s23 + $0x380] sm:$0xf]  ;;  %v1018_v44 = vunpack.c.l.b16 %v692_v8  ;;  %v1005_v46 = vunpack.c.l.b16 %v679_v32  ;;  %v1021_v52 = vunpack.c.l.b16 %v695_v11  ;;  %v3403_v37 = vor.u32 %v5333_v31, %v5330_v5  ;;  %v5414_v25 = vld [vmem:[%s5018_s23 + $0x4e4] sm:$0xf0]  ;;  %v5446_v32 = vld [vmem:[%s5018_s23 + $0x454] sm:$0xf0] }
  0x81   : > { %2420 = vmatpush.bf16.msrb.mxu0 %v3419_v38  ;;  %v1037_v38 = vsel %vm1034_vm0, %v1020_v7, %v1004_v57  ;;  %v558_v53 = vrot.slane %v557_v14, 1  ;;  %v463_v59 = vadd.f32 %v462_v47, %v461_v9  ;;  %v3467_v62 = vor.u32 %v5342_v33, %v5339_v10  ;;  %v5420_v1 = vld [vmem:[%s5018_s23 + $0x564] sm:$0xf0]  ;;  %v5449_v9 = vld [vmem:[%s5018_s23 + $0x4d0] sm:$0xf]  ;;  %v424_v11 = vld [vmem:[%s5010_s7 + $0x20] sm:$0xff] }
  0x82   : > { %2433 = vmatpush.bf16.msrb.mxu1 %v3483_v39  ;;  %v442_v39 = vld [vmem:[%s5010_s7 + $0xb0] sm:$0xff]  ;;  %v5405_v24 = vpack.c.b16 %v1037_v38, %v1037_v38  ;;  %v1035_v58 = vsel %vm1034_vm0, %v1018_v44, %v1002_v17  ;;  %v1038_v35 = vsel %vm1034_vm0, %v1021_v52, %v1005_v46  ;;  %v3531_v2 = vor.u32 %v5348_v15, %v5345_v51  ;;  %v5431_v27 = vld [vmem:[%s5018_s23 + $0x5e4] sm:$0xf0]  ;;  %v5460_v57 = vld [vmem:[%s5018_s23 + $0x4d4] sm:$0xf0]  ;;  %s4764_s15 = sshra.s32 %s2959_s27, 4  ;;  %s4765_s15 = int_to_ptr.hbm [resolvable:$true] %s4764_s15 }
  0x83   : > { %2446 = vmatpush.bf16.msrb.mxu2 %v6447_v21  ;;  %v5422_v30 = vpack.c.b16 %v1035_v58, %v1035_v58  ;;  %v559_v26 = vadd.f32 %v558_v53, %v557_v14  ;;  %v5437_v4 = vpack.c.b16 %v1038_v35, %v1038_v35  ;;  %v6449_v5 = vor.u32 %v5278_v55, %v5273_v50  ;;  %v5463_v7 = vld [vmem:[%s5018_s23 + $0x550] sm:$0xf]  ;;  %v5483_v17 = vld [vmem:[%s5018_s23 + $0x5d4] sm:$0xf0]  ;;  %v440_v46 = vld [vmem:[%s5010_s7 + $0xa0] sm:$0xff]  ;;  %s4766_s16 = scalar_lea.hbm %s4765_s15, 2  ;;  %p4771_p6 = scmp.lt.s32.totalorder %s4765_s15, %s6480_s26 }
  0x84   : > { %2459 = vmatpush.bf16.msrb.mxu3 %v6448_v61  ;;  %2397 = vmatmul.bf16.vlgmr.msra.gmra.mxu2 %v5405_v24  ;;  %v677_v31 = vpack.c.bf16 %v463_v59, %v463_v59  ;;  %v3595_v6 = vor.u32 %v5354_v41, %v5351_v34  ;;  %v488_v8 = vrot.slane %v5372_v16, 4  ;;  %v6450_v10 = vor.u32 %v5287_v12, %v5281_v56  ;;  %v5477_v34 = vld [vmem:[%s5018_s23 + $0x554] sm:$0xf0]  ;;  %v5480_v41 = vld [vmem:[%s5018_s23 + $0x5d0] sm:$0xf]  ;;  %v441_v52 = vld [vmem:[%s5010_s7 + $0xa8] sm:$0xff]  ;;  %p4767_p3 = scmp.ne.s32.totalorder %s4765_s15, %s4766_s16 }
  0x85   : > { %2421 = vmatpush.bf16.msrb.mxu0 %v6449_v5  ;;  %v693_v50 = vpack.c.bf16 %v559_v26, %v559_v26  ;;  %v3715_v55 = vor.u32 %v5363_v19, %v5360_v18  ;;  %v3779_v33 = vor.u32 %v5369_v20, %v5366_v54  ;;  %v584_v51 = vrot.slane %v442_v39, 4  ;;  %2410 = vmatmul.bf16.vlgmr.msra.gmra.mxu3 %v5437_v4  ;;  %v443_v19 = vld [vmem:[%s5010_s7 + $0xb8] sm:$0xff]  ;;  %v425_v54 = vld [vmem:[%s5010_s7 + $0x28] sm:$0xff] }
  0x86   : > { %2371 = vmatmul.bf16.vlgmr.msra.gmra.mxu0 %v5422_v30  ;;  %2434 = vmatpush.bf16.msrb.mxu1 %v6450_v10  ;;  %v1003_v56 = vunpack.c.l.b16 %v677_v31  ;;  %v3843_v12 = vor.u32 %v5387_v60, %v5384_v40  ;;  %v3907_v14 = vor.u32 %v5393_v23, %v5390_v22  ;;  %v3707_v15 = vor.u32 %v5399_v29, %v5396_v28  ;;  %p4768_p4 = pnand %p4767_p3, %p4933_p9 }
  0x87   : > { %2447 = vmatpush.bf16.msrb.mxu2 %v3539_v49  ;;  %v1019_v13 = vunpack.c.l.b16 %v693_v50  ;;  %v3771_v36 = vor.u32 %v5414_v25, %v5411_v63  ;;  %v3835_v49 = vor.u32 %v5420_v1, %v5417_v0  ;;  %v3899_v44 = vor.u32 %v5431_v27, %v5428_v3 }
  0x88   : > { %2460 = vmatpush.bf16.msrb.mxu3 %v3603_v48  ;;  %v489_v47 = vadd.f32 %v488_v8, %v5372_v16  ;;  %v585_v18 = vadd.f32 %v584_v51, %v442_v39  ;;  %v3699_v42 = vor.u32 %v5446_v32, %v5434_v45  ;;  %v3763_v43 = vor.u32 %v5460_v57, %v5449_v9  ;;  %v427_v48 = vld [vmem:[%s5010_s7 + $0x38] sm:$0xff]  ;;  %v5535_v57 = vld [vmem:[%s5018_s23 + $0x4b0] sm:$0xf]  ;;  %p4769_p5 = pneg %p4768_p4 }
  0x89   : > { %2422 = vmatpush.bf16.msrb.mxu0 %v3403_v37  ;;  %v1036_v20 = vsel %vm1034_vm0, %v1019_v13, %v1003_v56  ;;  %v3827_v21 = vor.u32 %v5477_v34, %v5463_v7  ;;  %v3891_v16 = vor.u32 %v5483_v17, %v5480_v41  ;;  %v476_v38 = vrot.slane %v424_v11, 4  ;;  %v3754_v13 = vld [vmem:[%s5018_s23 + $0x4c0] sm:$0xf]  ;;  %v5532_v9 = vld [vmem:[%s5018_s23 + $0x434] sm:$0xf0] }
  0x8a   : > { %2435 = vmatpush.bf16.msrb.mxu1 %v3467_v62  ;;  %v5509_v53 = vpack.c.b16 %v1036_v20, %v1036_v20  ;;  %v490_v37 = vrot.slane %v489_v47, 2  ;;  %v586_v40 = vrot.slane %v585_v18, 2  ;;  %v572_v60 = vrot.slane %v440_v46, 4 }
  0x8b   : > { %2448 = vmatpush.bf16.msrb.mxu2 %v3531_v2  ;;  %v477_v22 = vadd.f32 %v476_v38, %v424_v11  ;;  %v494_v23 = vrot.slane %v427_v48, 4  ;;  %v590_v28 = vrot.slane %v443_v19, 4  ;;  %v482_v29 = vrot.slane %v425_v54, 4  ;;  %v5528_v38 = vld [vmem:[%s5018_s23 + $0x430] sm:$0xf] }
  0x8c   : > { %2461 = vmatpush.bf16.msrb.mxu3 %v3595_v6  ;;  %2384 = vmatmul.bf16.vlgmr.msra.gmra.mxu1 %v5509_v53  ;;  %v491_v39 = vadd.f32 %v490_v37, %v489_v47  ;;  %v587_v61 = vadd.f32 %v586_v40, %v585_v18  ;;  %v573_v58 = vadd.f32 %v572_v60, %v440_v46  ;;  %v578_v59 = vrot.slane %v441_v52, 4  ;;  %v5517_v18 = vld [vmem:[%s5018_s23 + $0x540] sm:$0xf] }
  0x8d   : > { %2467 = vmatpush.bf16.msra.mxu0 %v3715_v55  ;;  %v478_v62 = vrot.slane %v477_v22, 2  ;;  %v495_v63 = vadd.f32 %v494_v23, %v427_v48  ;;  %v591_v25 = vadd.f32 %v590_v28, %v443_v19  ;;  %v483_v0 = vadd.f32 %v482_v29, %v425_v54 }
  0x8e   : > { %2480 = vmatpush.bf16.msra.mxu1 %v3779_v33  ;;  %v492_v1 = vrot.slane %v491_v39, 1  ;;  %v588_v35 = vrot.slane %v587_v61, 1  ;;  %v574_v26 = vrot.slane %v573_v58, 2  ;;  %v579_v2 = vadd.f32 %v578_v59, %v441_v52  ;;  %v5552_v59 = vld [vmem:[%s5018_s23 + $0x5b0] sm:$0xf] }
  0x8f   : > { %2493 = vmatpush.bf16.msra.mxu2 %v3843_v12  ;;  %v479_v3 = vadd.f32 %v478_v62, %v477_v22  ;;  %v496_v27 = vrot.slane %v495_v63, 2  ;;  %v592_v45 = vrot.slane %v591_v25, 2  ;;  %v484_v5 = vrot.slane %v483_v0, 2  ;;  %v3690_v12 = vld [vmem:[%s5018_s23 + $0x440] sm:$0xf] }
  0x90   : > { %2506 = vmatpush.bf16.msra.mxu3 %v3907_v14  ;;  %v493_v31 = vadd.f32 %v492_v1, %v491_v39  ;;  %v589_v6 = vadd.f32 %v588_v35, %v587_v61  ;;  %v575_v8 = vadd.f32 %v574_v26, %v573_v58  ;;  %v580_v32 = vrot.slane %v579_v2, 2  ;;  %v4376_v14 = vld [vmem:[%s5018_s23 + $0x444] sm:$0xf0]  ;;  %v5541_v22 = vld [vmem:[%s5010_s7 + $0x40] sm:$0xff]  ;;  %v5546_v61 = vld [vmem:[%s5018_s23 + $0x530] sm:$0xf] }
  0x91   : > { %2468 = vmatpush.bf16.msra.mxu0 %v3707_v15  ;;  %v480_v10 = vrot.slane %v479_v3, 1  ;;  %v497_v50 = vadd.f32 %v496_v27, %v495_v63  ;;  %v593_v55 = vadd.f32 %v592_v45, %v591_v25  ;;  %v485_v33 = vadd.f32 %v484_v5, %v483_v0  ;;  %v5549_v58 = vld [vmem:[%s5018_s23 + $0x534] sm:$0xf0]  ;;  %v5558_v35 = vld [vmem:[%s5018_s23 + $0x420] sm:$0xf] }
  0x92   : > { %2481 = vmatpush.bf16.msra.mxu1 %v3771_v36  ;;  %v682_v51 = vpack.c.bf16 %v493_v31, %v493_v31  ;;  %v698_v7 = vpack.c.bf16 %v589_v6, %v589_v6  ;;  %v576_v11 = vrot.slane %v575_v8, 1  ;;  %v581_v56 = vadd.f32 %v580_v32, %v579_v2  ;;  %v4392_v36 = vld [vmem:[%s5018_s23 + $0x4c4] sm:$0xf0]  ;;  %v5555_v62 = vld [vmem:[%s5018_s23 + $0x5b4] sm:$0xf0] }
  0x93   : > { %2494 = vmatpush.bf16.msra.mxu2 %v3835_v49  ;;  %v481_v15 = vadd.f32 %v480_v10, %v479_v3  ;;  %v498_v34 = vrot.slane %v497_v50, 1  ;;  %v594_v41 = vrot.slane %v593_v55, 1  ;;  %v486_v17 = vrot.slane %v485_v33, 1  ;;  %v5561_v26 = vld [vmem:[%s5018_s23 + $0x424] sm:$0xf0] }
  0x94   : > { %2507 = vmatpush.bf16.msra.mxu3 %v3899_v44  ;;  %v1008_v49 = vunpack.c.l.b16 %v682_v51  ;;  %v1024_v44 = vunpack.c.l.b16 %v698_v7  ;;  %v577_v46 = vadd.f32 %v576_v11, %v575_v8  ;;  %v582_v47 = vrot.slane %v581_v56, 1  ;;  %v5564_v2 = vld [vmem:[%s5018_s23 + $0x4a0] sm:$0xf]  ;;  %v5567_v3 = vld [vmem:[%s5018_s23 + $0x4a4] sm:$0xf0] }
  0x95   : > { %2469 = vmatpush.bf16.msra.mxu0 %v3699_v42  ;;  %v5520_v42 = vld [vmem:[%s5018_s23 + $0x544] sm:$0xf0]  ;;  %v680_v48 = vpack.c.bf16 %v481_v15, %v481_v15  ;;  %v499_v19 = vadd.f32 %v498_v34, %v497_v50  ;;  %v595_v54 = vadd.f32 %v594_v41, %v593_v55  ;;  %v487_v20 = vadd.f32 %v486_v17, %v485_v33  ;;  %v5570_v27 = vld [vmem:[%s5018_s23 + $0x520] sm:$0xf]  ;;  %v5585_v50 = vld [vmem:[%s5018_s23 + $0x410] sm:$0xf] }
  0x96   : > { %2482 = vmatpush.bf16.msra.mxu1 %v3763_v43  ;;  %v1041_v52 = vsel %vm1034_vm0, %v1024_v44, %v1008_v49  ;;  %v696_v37 = vpack.c.bf16 %v577_v46, %v577_v46  ;;  %v583_v40 = vadd.f32 %v582_v47, %v581_v56  ;;  %v3691_v60 = vor.u32 %v4376_v14, %v3690_v12  ;;  %v5538_v43 = vld [vmem:[%s5018_s23 + $0x4b4] sm:$0xf0]  ;;  %v5573_v45 = vld [vmem:[%s5018_s23 + $0x524] sm:$0xf0]  ;;  %v5579_v32 = vld [vmem:[%s5018_s23 + $0x5a0] sm:$0xf] }
  0x97   : > { %2495 = vmatpush.bf16.msra.mxu2 %v3827_v21  ;;  %v3882_v21 = vld [vmem:[%s5018_s23 + $0x5c0] sm:$0xf]  ;;  %v5543_v23 = vpack.c.b16 %v1041_v52, %v1041_v52  ;;  %v1006_v28 = vunpack.c.l.b16 %v680_v48  ;;  %v683_v29 = vpack.c.bf16 %v499_v19, %v499_v19  ;;  %v699_v39 = vpack.c.bf16 %v595_v54, %v595_v54  ;;  %v5582_v10 = vld [vmem:[%s5018_s23 + $0x5a4] sm:$0xf0]  ;;  %v5588_v55 = vld [vmem:[%s5018_s23 + $0x414] sm:$0xf0] }
  0x98   : > { %2508 = vmatpush.bf16.msra.mxu3 %v3891_v16  ;;  %v4424_v16 = vld [vmem:[%s5018_s23 + $0x5c4] sm:$0xf0]  ;;  %v1022_v63 = vunpack.c.l.b16 %v696_v37  ;;  %v681_v25 = vpack.c.bf16 %v487_v20, %v487_v20  ;;  %v697_v0 = vpack.c.bf16 %v583_v40, %v583_v40  ;;  %v3755_v1 = vor.u32 %v4392_v36, %v3754_v13  ;;  %v5591_v33 = vld [vmem:[%s5018_s23 + $0x490] sm:$0xf]  ;;  %v5594_v51 = vld [vmem:[%s5018_s23 + $0x494] sm:$0xf0] }
  0x99   : > { %6451 = vst [vmem:[#allocation24_spill] sm:$0xff] %v5543_v23  ;;  %2470 = vmatpush.bf16.msra.mxu0 %v3691_v60  ;;  %2449 = vmatmul.bf16.vlgmr.msrb.gmra.mxu2 %v5543_v23  ;;  %v1009_v5 = vunpack.c.l.b16 %v683_v29  ;;  %v1025_v31 = vunpack.c.l.b16 %v699_v39  ;;  %v3819_v6 = vor.u32 %v5520_v42, %v5517_v18  ;;  %v3883_v8 = vor.u32 %v4424_v16, %v3882_v21  ;;  %v5597_v7 = vld [vmem:[%s5010_s7 + $0xc0] sm:$0xff]  ;;  %v5603_v15 = vld [vmem:[%s5018_s23 + $0x510] sm:$0xf]  ;;  %v5606_v34 = vld [vmem:[%s5018_s23 + $0x514] sm:$0xf0] }
  0x9a   : > { %v1039_v11 = vsel %vm1034_vm0, %v1022_v63, %v1006_v28  ;;  %v1007_v56 = vunpack.c.l.b16 %v681_v25  ;;  %v1023_v12 = vunpack.c.l.b16 %v697_v0  ;;  %2483 = vmatpush.bf16.msra.mxu1 %v3755_v1  ;;  %v3683_v14 = vor.u32 %v5532_v9, %v5528_v38  ;;  %v5609_v41 = vld [vmem:[%s5018_s23 + $0x590] sm:$0xf]  ;;  %v5612_v17 = vld [vmem:[%s5018_s23 + $0x594] sm:$0xf0]  ;;  %v5615_v13 = vld [vmem:[%s5018_s23 + $0x400] sm:$0xf] }
  0x9b   : > { %v5618_v36 = vld [vmem:[%s5018_s23 + $0x404] sm:$0xf0]  ;;  %v430_v49 = vld [vmem:[%s5010_s7 + $0x50] sm:$0xff]  ;;  %v5621_v44 = vpack.c.b16 %v1039_v11, %v1039_v11  ;;  %v1042_v46 = vsel %vm1034_vm0, %v1025_v31, %v1009_v5  ;;  %2496 = vmatpush.bf16.msra.mxu2 %v3819_v6  ;;  %v3747_v47 = vor.u32 %v5538_v43, %v5535_v57  ;;  %v5627_v18 = vld [vmem:[%s5018_s23 + $0x480] sm:$0xf]  ;;  %v500_v21 = vrot.slane %v5541_v22, 4 }
  0x9c   : > { %2509 = vmatpush.bf16.msra.mxu3 %v3883_v8  ;;  %v5630_v42 = vld [vmem:[%s5018_s23 + $0x484] sm:$0xf0]  ;;  %v5633_v48 = vld [vmem:[%s5018_s23 + $0x500] sm:$0xf]  ;;  %v446_v16 = vld [vmem:[%s5010_s7 + $0xd0] sm:$0xff]  ;;  %v5646_v38 = vpack.c.b16 %v1042_v46, %v1042_v46  ;;  %v1040_v52 = vsel %vm1034_vm0, %v1023_v12, %v1007_v56  ;;  %v3811_v37 = vor.u32 %v5549_v58, %v5546_v61  ;;  %v3875_v40 = vor.u32 %v5555_v62, %v5552_v59 }
  0x9d   : > { %6452 = vst [vmem:[#allocation25_spill] sm:$0xff] %v5621_v44  ;;  %v5636_v19 = vld [vmem:[%s5018_s23 + $0x504] sm:$0xf0]  ;;  %v5639_v54 = vld [vmem:[%s5018_s23 + $0x580] sm:$0xf]  ;;  %2471 = vmatpush.bf16.msra.mxu0 %v3683_v14  ;;  %v5663_v43 = vpack.c.b16 %v1040_v52, %v1040_v52  ;;  %v3675_v28 = vor.u32 %v5561_v26, %v5558_v35  ;;  %v3739_v29 = vor.u32 %v5567_v3, %v5564_v2  ;;  %v596_v35 = vrot.slane %v5597_v7, 4 }
  0x9e   : > { %v5642_v20 = vld [vmem:[%s5018_s23 + $0x584] sm:$0xf0]  ;;  %6453 = vst [vmem:[#allocation26_spill] sm:$0xff] %v5646_v38  ;;  %v5654_v60 = vld [vmem:[%s5018_s23 + $0x670] sm:$0xf]  ;;  %2423 = vmatmul.bf16.vlgmr.msrb.gmra.mxu0 %v5621_v44  ;;  %v3803_v39 = vor.u32 %v5573_v45, %v5570_v27  ;;  %2462 = vmatmul.bf16.vlgmr.msrb.gmra.mxu3 %v5646_v38  ;;  %v3867_v62 = vor.u32 %v5582_v10, %v5579_v32  ;;  %v512_v27 = vrot.slane %v430_v49, 4 }
  0x9f   : > { %v5657_v9 = vld [vmem:[%s5018_s23 + $0x674] sm:$0xf0]  ;;  %v5660_v57 = vld [vmem:[%s5018_s23 + $0x6f0] sm:$0xf]  ;;  %6454 = vst [vmem:[#allocation27_spill] sm:$0xff] %v5663_v43  ;;  %2484 = vmatpush.bf16.msra.mxu1 %v3747_v47  ;;  %v3667_v63 = vor.u32 %v5588_v55, %v5585_v50  ;;  %v3731_v25 = vor.u32 %v5594_v51, %v5591_v33  ;;  %2497 = vmatpush.bf16.msra.mxu2 %v3811_v37  ;;  %v429_v45 = vld [vmem:[%s5010_s7 + $0x48] sm:$0xff] }
  0xa0   : > { %v5672_v61 = vld [vmem:[%s5018_s23 + $0x6f4] sm:$0xf0]  ;;  %v5675_v58 = vld [vmem:[%s5018_s23 + $0x770] sm:$0xf]  ;;  %2436 = vmatmul.bf16.vlgmr.msrb.gmra.mxu1 %v5663_v43  ;;  %v3795_v26 = vor.u32 %v5606_v34, %v5603_v15  ;;  %v3859_v2 = vor.u32 %v5612_v17, %v5609_v41  ;;  %v3659_v3 = vor.u32 %v5618_v36, %v5615_v13  ;;  %2510 = vmatpush.bf16.msra.mxu3 %v3875_v40  ;;  %v608_v8 = vrot.slane %v446_v16, 4  ;;  %v445_v32 = vld [vmem:[%s5010_s7 + $0xc8] sm:$0xff] }
  0xa1   : > { %v5678_v59 = vld [vmem:[%s5018_s23 + $0x774] sm:$0xf0]  ;;  %v5688_v0 = vld [vmem:[%s5018_s23 + $0x7f0] sm:$0xf]  ;;  %2472 = vmatpush.bf16.msra.mxu0 %v3675_v28  ;;  %v3723_v5 = vor.u32 %v5630_v42, %v5627_v18  ;;  %v3787_v31 = vor.u32 %v5636_v19, %v5633_v48  ;;  %v3851_v6 = vor.u32 %v5642_v20, %v5639_v54  ;;  %v3971_v55 = vor.u32 %v5657_v9, %v5654_v60 }
  0xa2   : > { %v5691_v1 = vld [vmem:[%s5018_s23 + $0x7f4] sm:$0xf0]  ;;  %v4035_v33 = vor.u32 %v5672_v61, %v5660_v57  ;;  %v4099_v51 = vor.u32 %v5678_v59, %v5675_v58  ;;  %v501_v56 = vadd.f32 %v500_v21, %v5541_v22  ;;  %v597_v12 = vadd.f32 %v596_v35, %v5597_v7 }
  0xa3   : > { %v431_v10 = vld [vmem:[%s5010_s7 + $0x58] sm:$0xff]  ;;  %v4163_v11 = vor.u32 %v5691_v1, %v5688_v0  ;;  %2485 = vmatpush.bf16.msra.mxu1 %v3739_v29  ;;  %v513_v14 = vadd.f32 %v512_v27, %v430_v49  ;;  %v609_v15 = vadd.f32 %v608_v8, %v446_v16  ;;  %2498 = vmatpush.bf16.msra.mxu2 %v3803_v39  ;;  %v506_v34 = vrot.slane %v429_v45, 4  ;;  %v3962_v27 = vld [vmem:[%s5018_s23 + $0x660] sm:$0xf] }
  0xa4   : > { %v447_v50 = vld [vmem:[%s5010_s7 + $0xd8] sm:$0xff]  ;;  %v602_v41 = vrot.slane %v445_v32, 4  ;;  %v518_v17 = vrot.slane %v431_v10, 4  ;;  %2511 = vmatpush.bf16.msra.mxu3 %v3867_v62  ;;  %v502_v36 = vrot.slane %v501_v56, 2  ;;  %v598_v46 = vrot.slane %v597_v12, 2 }
  0xa5   : > { %v614_v13 = vrot.slane %v447_v50, 4  ;;  %2473 = vmatpush.bf16.msra.mxu0 %v3667_v63  ;;  %v514_v47 = vrot.slane %v513_v14, 2  ;;  %v610_v18 = vrot.slane %v609_v15, 2  ;;  %v507_v42 = vadd.f32 %v506_v34, %v429_v45  ;;  %v4444_v45 = vld [vmem:[%s5018_s23 + $0x664] sm:$0xf0] }
  0xa6   : > { %v603_v48 = vadd.f32 %v602_v41, %v445_v32  ;;  %v519_v19 = vadd.f32 %v518_v17, %v431_v10  ;;  %v503_v22 = vadd.f32 %v502_v36, %v501_v56  ;;  %v599_v7 = vadd.f32 %v598_v46, %v597_v12  ;;  %v5741_v34 = vld [vmem:[%s5018_s23 + $0x654] sm:$0xf0]  ;;  %v5744_v41 = vld [vmem:[%s5018_s23 + $0x6d0] sm:$0xf] }
  0xa7   : > { %v615_v54 = vadd.f32 %v614_v13, %v447_v50  ;;  %2486 = vmatpush.bf16.msra.mxu1 %v3731_v25  ;;  %v515_v49 = vadd.f32 %v514_v47, %v513_v14  ;;  %v611_v20 = vadd.f32 %v610_v18, %v609_v15  ;;  %2499 = vmatpush.bf16.msra.mxu2 %v3795_v26  ;;  %v508_v21 = vrot.slane %v507_v42, 2  ;;  %v4460_v50 = vld [vmem:[%s5018_s23 + $0x6e4] sm:$0xf0]  ;;  %v5732_v14 = vld [vmem:[%s5018_s23 + $0x7e0] sm:$0xf] }
  0xa8   : > { %v604_v16 = vrot.slane %v603_v48, 2  ;;  %v520_v52 = vrot.slane %v519_v19, 2  ;;  %2512 = vmatpush.bf16.msra.mxu3 %v3859_v2  ;;  %v504_v40 = vrot.slane %v503_v22, 1  ;;  %v600_v60 = vrot.slane %v599_v7, 1  ;;  %v5738_v15 = vld [vmem:[%s5018_s23 + $0x650] sm:$0xf] }
  0xa9   : > { %v616_v37 = vrot.slane %v615_v54, 2  ;;  %2474 = vmatpush.bf16.msra.mxu0 %v3659_v3  ;;  %v516_v9 = vrot.slane %v515_v49, 1  ;;  %v612_v57 = vrot.slane %v611_v20, 1  ;;  %v509_v28 = vadd.f32 %v508_v21, %v507_v42  ;;  %v5747_v47 = vld [vmem:[%s5018_s23 + $0x6d4] sm:$0xf0] }
  0xaa   : > { %v605_v29 = vadd.f32 %v604_v16, %v603_v48  ;;  %v521_v39 = vadd.f32 %v520_v52, %v519_v19  ;;  %v505_v58 = vadd.f32 %v504_v40, %v503_v22  ;;  %v601_v59 = vadd.f32 %v600_v60, %v599_v7  ;;  %v5750_v18 = vld [vmem:[%s5018_s23 + $0x750] sm:$0xf]  ;;  %v5753_v42 = vld [vmem:[%s5018_s23 + $0x754] sm:$0xf0]  ;;  %v5766_v21 = vld [vmem:[%s5018_s23 + $0x644] sm:$0xf0] }
  0xab   : > { %v617_v61 = vadd.f32 %v616_v37, %v615_v54  ;;  %2487 = vmatpush.bf16.msra.mxu1 %v3723_v5  ;;  %v517_v62 = vadd.f32 %v516_v9, %v515_v49  ;;  %v613_v63 = vadd.f32 %v612_v57, %v611_v20  ;;  %2500 = vmatpush.bf16.msra.mxu2 %v3787_v31  ;;  %v510_v25 = vrot.slane %v509_v28, 1  ;;  %v4026_v5 = vld [vmem:[%s5018_s23 + $0x6e0] sm:$0xf]  ;;  %v5757_v7 = vld [vmem:[%s5018_s23 + $0x7d0] sm:$0xf] }
  0xac   : > { %v606_v0 = vrot.slane %v605_v29, 1  ;;  %v522_v1 = vrot.slane %v521_v39, 1  ;;  %2513 = vmatpush.bf16.msra.mxu3 %v3851_v6  ;;  %v684_v26 = vpack.c.bf16 %v505_v58, %v505_v58  ;;  %v700_v2 = vpack.c.bf16 %v601_v59, %v601_v59  ;;  %v5726_v6 = vld [vmem:[%s5018_s23 + $0x760] sm:$0xf]  ;;  %v5760_v49 = vld [vmem:[%s5018_s23 + $0x7d4] sm:$0xf0] }
  0xad   : > { %2519 = vmatpush.bf16.msrb.mxu0 %v3971_v55  ;;  %v618_v35 = vrot.slane %v617_v61, 1  ;;  %v686_v3 = vpack.c.bf16 %v517_v62, %v517_v62  ;;  %v702_v31 = vpack.c.bf16 %v613_v63, %v613_v63  ;;  %v511_v8 = vadd.f32 %v510_v25, %v509_v28  ;;  %v5729_v55 = vld [vmem:[%s5018_s23 + $0x764] sm:$0xf0]  ;;  %v5763_v20 = vld [vmem:[%s5018_s23 + $0x640] sm:$0xf] }
  0xae   : > { %v607_v32 = vadd.f32 %v606_v0, %v605_v29  ;;  %v523_v10 = vadd.f32 %v522_v1, %v521_v39  ;;  %v3963_v54 = vor.u32 %v4444_v45, %v3962_v27  ;;  %v4027_v22 = vor.u32 %v4460_v50, %v4026_v5  ;;  %v5772_v60 = vld [vmem:[%s5018_s23 + $0x6c0] sm:$0xf]  ;;  %v5775_v9 = vld [vmem:[%s5018_s23 + $0x6c4] sm:$0xf0]  ;;  %v5797_v25 = vld [vmem:[%s5018_s23 + $0x630] sm:$0xf] }
  0xaf   : > { %2532 = vmatpush.bf16.msrb.mxu1 %v4035_v33  ;;  %2545 = vmatpush.bf16.msrb.mxu2 %v4099_v51  ;;  %v1010_v33 = vunpack.c.l.b16 %v684_v26  ;;  %v1026_v51 = vunpack.c.l.b16 %v700_v2  ;;  %v1012_v56 = vunpack.c.l.b16 %v686_v3  ;;  %v619_v12 = vadd.f32 %v618_v35, %v617_v61  ;;  %v5778_v57 = vld [vmem:[%s5018_s23 + $0x740] sm:$0xf]  ;;  %v5781_v28 = vld [vmem:[%s5018_s23 + $0x744] sm:$0xf0]  ;;  %v5800_v0 = vld [vmem:[%s5018_s23 + $0x634] sm:$0xf0] }
  0xb0   : > { %2558 = vmatpush.bf16.msrb.mxu3 %v4163_v11  ;;  %v5735_v11 = vld [vmem:[%s5018_s23 + $0x7e4] sm:$0xf0]  ;;  %v1028_v17 = vunpack.c.l.b16 %v702_v31  ;;  %v685_v13 = vpack.c.bf16 %v511_v8, %v511_v8  ;;  %v701_v36 = vpack.c.bf16 %v607_v32, %v607_v32  ;;  %v687_v46 = vpack.c.bf16 %v523_v10, %v523_v10  ;;  %v5784_v29 = vld [vmem:[%s5018_s23 + $0x7c0] sm:$0xf]  ;;  %v5803_v1 = vld [vmem:[%s5018_s23 + $0x6b0] sm:$0xf] }
  0xb1   : > { %v1043_v48 = vsel %vm1034_vm0, %v1026_v51, %v1010_v33  ;;  %v703_v19 = vpack.c.bf16 %v619_v12, %v619_v12  ;;  %v5787_v39 = vld [vmem:[%s5018_s23 + $0x7c4] sm:$0xf0]  ;;  %v5790_v61 = vld [vmem:[%s5010_s7 + $0x60] sm:$0xff]  ;;  %2520 = vmatpush.bf16.msrb.mxu0 %v3963_v54  ;;  %v4091_v63 = vor.u32 %v5729_v55, %v5726_v6  ;;  %v5806_v35 = vld [vmem:[%s5018_s23 + $0x6b4] sm:$0xf0]  ;;  %v4155_v45 = vor.u32 %v5735_v11, %v5732_v14 }
  0xb2   : > { %v5768_v16 = vpack.c.b16 %v1043_v48, %v1043_v48  ;;  %v1045_v52 = vsel %vm1034_vm0, %v1028_v17, %v1012_v56  ;;  %v1011_v37 = vunpack.c.l.b16 %v685_v13  ;;  %v1027_v40 = vunpack.c.l.b16 %v701_v36  ;;  %v5809_v26 = vld [vmem:[%s5018_s23 + $0x730] sm:$0xf]  ;;  %v5812_v2 = vld [vmem:[%s5018_s23 + $0x734] sm:$0xf0]  ;;  %v5815_v3 = vld [vmem:[%s5010_s7 + $0xe0] sm:$0xff] }
  0xb3   : > { %v5792_v58 = vpack.c.b16 %v1045_v52, %v1045_v52  ;;  %v1013_v59 = vunpack.c.l.b16 %v687_v46  ;;  %v1029_v62 = vunpack.c.l.b16 %v703_v19  ;;  %2533 = vmatpush.bf16.msrb.mxu1 %v4027_v22  ;;  %v3955_v5 = vor.u32 %v5741_v34, %v5738_v15  ;;  %v5826_v8 = vld [vmem:[%s5018_s23 + $0x7b0] sm:$0xf]  ;;  %v5829_v32 = vld [vmem:[%s5018_s23 + $0x7b4] sm:$0xf0]  ;;  %v5832_v10 = vld [vmem:[%s5018_s23 + $0x620] sm:$0xf]  ;;  %2546 = vmatpush.bf16.msrb.mxu2 %v4091_v63 }
  0xb4   : > { %6455 = vst [vmem:[#allocation28_spill] sm:$0xff] %v5768_v16  ;;  %2475 = vmatmul.bf16.vlgmr.msra.gmra.mxu0 %v5768_v16  ;;  %v1044_v27 = vsel %vm1034_vm0, %v1027_v40, %v1011_v37  ;;  %v4019_v31 = vor.u32 %v5747_v47, %v5744_v41  ;;  %v5835_v50 = vld [vmem:[%s5018_s23 + $0x624] sm:$0xf0]  ;;  %v5838_v6 = vld [vmem:[%s5018_s23 + $0x6a0] sm:$0xf]  ;;  %v5844_v33 = vld [vmem:[%s5010_s7 + $0x70] sm:$0xff]  ;;  %v4083_v12 = vor.u32 %v5753_v42, %v5750_v18 }
  0xb5   : > { %6456 = vst [vmem:[#allocation29_spill] sm:$0xff] %v5792_v58  ;;  %v5841_v55 = vld [vmem:[%s5018_s23 + $0x6a4] sm:$0xf0]  ;;  %2501 = vmatmul.bf16.vlgmr.msra.gmra.mxu2 %v5792_v58  ;;  %v5847_v51 = vpack.c.b16 %v1044_v27, %v1044_v27  ;;  %v1046_v56 = vsel %vm1034_vm0, %v1029_v62, %v1013_v59  ;;  %v5853_v14 = vld [vmem:[%s5018_s23 + $0x720] sm:$0xf]  ;;  %2559 = vmatpush.bf16.msrb.mxu3 %v4155_v45  ;;  %v524_v62 = vrot.slane %v5790_v61, 4 }
  0xb6   : > { %v5856_v11 = vld [vmem:[%s5018_s23 + $0x724] sm:$0xf0]  ;;  %v5859_v15 = vld [vmem:[%s5018_s23 + $0x7a0] sm:$0xf]  ;;  %v5865_v41 = vld [vmem:[%s5018_s23 + $0x610] sm:$0xf]  ;;  %v5870_v13 = vpack.c.b16 %v1046_v56, %v1046_v56  ;;  %v4147_v36 = vor.u32 %v5760_v49, %v5757_v7  ;;  %v3947_v46 = vor.u32 %v5766_v21, %v5763_v20  ;;  %2521 = vmatpush.bf16.msrb.mxu0 %v3955_v5  ;;  %v4011_v49 = vor.u32 %v5775_v9, %v5772_v60 }
  0xb7   : > { %6457 = vst [vmem:[#allocation30_spill] sm:$0xff] %v5847_v51  ;;  %v5862_v34 = vld [vmem:[%s5018_s23 + $0x7a4] sm:$0xf0]  ;;  %v5868_v17 = vld [vmem:[%s5018_s23 + $0x614] sm:$0xf0]  ;;  %2488 = vmatmul.bf16.vlgmr.msra.gmra.mxu1 %v5847_v51  ;;  %v4075_v20 = vor.u32 %v5781_v28, %v5778_v57  ;;  %v4139_v21 = vor.u32 %v5787_v39, %v5784_v29  ;;  %v450_v63 = vld [vmem:[%s5010_s7 + $0xf0] sm:$0xff]  ;;  %v3939_v60 = vor.u32 %v5800_v0, %v5797_v25 }
  0xb8   : > { %6458 = vst [vmem:[#allocation31_spill] sm:$0xff] %v5870_v13  ;;  %v5877_v47 = vld [vmem:[%s5018_s23 + $0x690] sm:$0xf]  ;;  %v5880_v18 = vld [vmem:[%s5018_s23 + $0x694] sm:$0xf0]  ;;  %2514 = vmatmul.bf16.vlgmr.msra.gmra.mxu3 %v5870_v13  ;;  %2534 = vmatpush.bf16.msrb.mxu1 %v4019_v31  ;;  %v4003_v9 = vor.u32 %v5806_v35, %v5803_v1  ;;  %v4067_v57 = vor.u32 %v5812_v2, %v5809_v26  ;;  %v620_v39 = vrot.slane %v5815_v3, 4 }
  0xb9   : > { %v5883_v42 = vld [vmem:[%s5018_s23 + $0x710] sm:$0xf]  ;;  %v5886_v48 = vld [vmem:[%s5018_s23 + $0x714] sm:$0xf0]  ;;  %v5895_v22 = vld [vmem:[%s5018_s23 + $0x600] sm:$0xf]  ;;  %v4131_v27 = vor.u32 %v5829_v32, %v5826_v8  ;;  %v3931_v25 = vor.u32 %v5835_v50, %v5832_v10  ;;  %v3995_v0 = vor.u32 %v5841_v55, %v5838_v6  ;;  %2547 = vmatpush.bf16.msrb.mxu2 %v4083_v12  ;;  %2560 = vmatpush.bf16.msrb.mxu3 %v4147_v36 }
  0xba   : > { %v5889_v19 = vld [vmem:[%s5018_s23 + $0x790] sm:$0xf]  ;;  %v5892_v54 = vld [vmem:[%s5018_s23 + $0x794] sm:$0xf0]  ;;  %v5898_v7 = vld [vmem:[%s5018_s23 + $0x604] sm:$0xf0]  ;;  %2522 = vmatpush.bf16.msrb.mxu0 %v3947_v46  ;;  %v525_v45 = vadd.f32 %v524_v62, %v5790_v61 }
  0xbb   : > { %v5908_v52 = vld [vmem:[%s5018_s23 + $0x680] sm:$0xf]  ;;  %v5911_v37 = vld [vmem:[%s5018_s23 + $0x684] sm:$0xf0]  ;;  %v5942_v1 = vld [vmem:[%s5018_s23 + $0x74] sm:$0xf] }
  0xbc   : > { %v5914_v40 = vld [vmem:[%s5018_s23 + $0x700] sm:$0xf]  ;;  %v5917_v59 = vld [vmem:[%s5018_s23 + $0x704] sm:$0xf0]  ;;  %v5945_v35 = vld [vmem:[%s5018_s23 + $0x78] sm:$0xf0]  ;;  %2535 = vmatpush.bf16.msrb.mxu1 %v4011_v49  ;;  %v621_v49 = vadd.f32 %v620_v39, %v5815_v3 }
  0xbd   : > { %v5929_v28 = vld [vmem:[%s5018_s23 + $0x780] sm:$0xf]  ;;  %v5932_v29 = vld [vmem:[%s5018_s23 + $0x784] sm:$0xf0]  ;;  %v536_v26 = vrot.slane %v5844_v33, 4  ;;  %v632_v32 = vrot.slane %v450_v63, 4  ;;  %2548 = vmatpush.bf16.msrb.mxu2 %v4075_v20  ;;  %2561 = vmatpush.bf16.msrb.mxu3 %v4139_v21 }
  0xbe   : > { %v5955_v31 = vld [vmem:[%s5018_s23 + $0xf4] sm:$0xf]  ;;  %v5958_v8 = vld [vmem:[%s5018_s23 + $0xf8] sm:$0xf0]  ;;  %v433_v56 = vld [vmem:[%s5010_s7 + $0x68] sm:$0xff]  ;;  %2523 = vmatpush.bf16.msrb.mxu0 %v3939_v60  ;;  %v526_v10 = vrot.slane %v525_v45, 2 }
  0xbf   : > { %v449_v12 = vld [vmem:[%s5010_s7 + $0xe8] sm:$0xff]  ;;  %v435_v36 = vld [vmem:[%s5010_s7 + $0x78] sm:$0xff]  ;;  %v537_v2 = vadd.f32 %v536_v26, %v5844_v33  ;;  %v633_v5 = vadd.f32 %v632_v32, %v450_v63  ;;  %v530_v46 = vrot.slane %v433_v56, 4  ;;  %v622_v58 = vrot.slane %v621_v49, 2 }
  0xc0   : > { %v451_v6 = vld [vmem:[%s5010_s7 + $0xf8] sm:$0xff]  ;;  %v626_v13 = vrot.slane %v449_v12, 4  ;;  %v542_v51 = vrot.slane %v435_v36, 4  ;;  %2536 = vmatpush.bf16.msrb.mxu1 %v4003_v9  ;;  %v527_v62 = vadd.f32 %v526_v10, %v525_v45  ;;  %v6461_v10 = vor.u32 %v5868_v17, %v5865_v41  ;;  %s4770_s7 = scalar_lea.hbm %s6480_s26, 8 }
  0xc1   : > { %v538_v50 = vrot.slane %v537_v2, 2  ;;  %v638_v16 = vrot.slane %v451_v6, 4  ;;  %v634_v43 = vrot.slane %v633_v5, 2  ;;  %v531_v55 = vadd.f32 %v530_v46, %v433_v56  ;;  %2549 = vmatpush.bf16.msrb.mxu2 %v4067_v57  ;;  %2562 = vmatpush.bf16.msrb.mxu3 %v4131_v27  ;;  %p4772_p7 = scmp.lt.s32.totalorder %s4770_s7, %s4766_s16 }
  0xc2   : > { %v627_v38 = vadd.f32 %v626_v13, %v449_v12  ;;  %v543_v61 = vadd.f32 %v542_v51, %v435_v36  ;;  %v623_v3 = vadd.f32 %v622_v58, %v621_v49  ;;  %2524 = vmatpush.bf16.msrb.mxu0 %v3931_v25  ;;  %v528_v60 = vrot.slane %v527_v62, 1 }
  0xc3   : > { %v539_v39 = vadd.f32 %v538_v50, %v537_v2  ;;  %v639_v33 = vadd.f32 %v638_v16, %v451_v6  ;;  %v635_v20 = vadd.f32 %v634_v43, %v633_v5  ;;  %v532_v21 = vrot.slane %v531_v55, 2  ;;  %p4773_p8 = por %p4772_p7, %p4771_p6 }
  0xc4   : > { %v628_v63 = vrot.slane %v627_v38, 2  ;;  %v544_v26 = vrot.slane %v543_v61, 2  ;;  %v624_v32 = vrot.slane %v623_v3, 1  ;;  %2537 = vmatpush.bf16.msrb.mxu1 %v3995_v0  ;;  %v529_v58 = vadd.f32 %v528_v60, %v527_v62  ;;  %v3196_v60 = vld [vmem:[%s5018_s23 + $0x68] sm:$0xf0] }
  0xc5   : > { %v540_v44 = vrot.slane %v539_v39, 1  ;;  %v640_v23 = vrot.slane %v639_v33, 2  ;;  %v636_v9 = vrot.slane %v635_v20, 1  ;;  %v533_v13 = vadd.f32 %v532_v21, %v531_v55  ;;  %p4774_p10 = pnand %p4773_p8, %p4769_p5 }
  0xc6   : > { %v629_v51 = vadd.f32 %v628_v63, %v627_v38  ;;  %v545_v45 = vadd.f32 %v544_v26, %v543_v61  ;;  %v625_v2 = vadd.f32 %v624_v32, %v623_v3  ;;  %v6459_v57 = vor.u32 %v5856_v11, %v5853_v14  ;;  %2525 = vmatpush.bf16.msrb.mxu0 %v6461_v10  ;;  %v3332_v11 = vld [vmem:[%s5018_s23 + $0x178] sm:$0xf0] }
  0xc7   : > { %v541_v16 = vadd.f32 %v540_v44, %v539_v39  ;;  %v641_v43 = vadd.f32 %v640_v23, %v639_v33  ;;  %v6460_v27 = vor.u32 %v5862_v34, %v5859_v15  ;;  %v637_v25 = vadd.f32 %v636_v9, %v635_v20  ;;  %v4285_v44 = vld [vmem:[%s5018_s23 + $0x174] sm:$0xf]  ;;  %v3396_v34 = vld [vmem:[%s5018_s23 + $0x1f8] sm:$0xf0]  ;;  %v4251_v20 = vld [vmem:[%s5018_s23 + $0x64] sm:$0xf] }
  0xc8   : > { %2550 = vmatpush.bf16.msrb.mxu2 %v6459_v57  ;;  %v534_v0 = vrot.slane %v533_v13, 1  ;;  %v630_v5 = vrot.slane %v629_v51, 1  ;;  %v546_v38 = vrot.slane %v545_v45, 1  ;;  %v688_v50 = vpack.c.bf16 %v529_v58, %v529_v58  ;;  %v4301_v15 = vld [vmem:[%s5018_s23 + $0x1f4] sm:$0xf] }
  0xc9   : > { %2563 = vmatpush.bf16.msrb.mxu3 %v6460_v27  ;;  %v704_v23 = vpack.c.bf16 %v625_v2, %v625_v2  ;;  %v690_v6 = vpack.c.bf16 %v541_v16, %v541_v16  ;;  %v642_v55 = vrot.slane %v641_v43, 1  ;;  %v6462_v14 = vor.u32 %v5880_v18, %v5877_v47  ;;  %v3324_v58 = vld [vmem:[%s5018_s23 + $0x168] sm:$0xf0]  ;;  %v3252_v10 = vld [vmem:[%s5018_s23 + $0xd8] sm:$0xf0] }
  0xca   : > { %v706_v56 = vpack.c.bf16 %v637_v25, %v637_v25  ;;  %v535_v12 = vadd.f32 %v534_v0, %v533_v13  ;;  %v631_v36 = vadd.f32 %v630_v5, %v629_v51  ;;  %v547_v46 = vadd.f32 %v546_v38, %v545_v45  ;;  %v4283_v45 = vld [vmem:[%s5018_s23 + $0x164] sm:$0xf]  ;;  %v4249_v0 = vld [vmem:[%s5018_s23 + $0x54] sm:$0xf]  ;;  %v3188_v5 = vld [vmem:[%s5018_s23 + $0x58] sm:$0xf0] }
  0xcb   : > { %2538 = vmatpush.bf16.msrb.mxu1 %v6462_v14  ;;  %v1014_v49 = vunpack.c.l.b16 %v688_v50  ;;  %v1030_v41 = vunpack.c.l.b16 %v704_v23  ;;  %v1016_v17 = vunpack.c.l.b16 %v690_v6  ;;  %v643_v61 = vadd.f32 %v642_v55, %v641_v43  ;;  %v3316_v50 = vld [vmem:[%s5018_s23 + $0x158] sm:$0xf0]  ;;  %v4297_v23 = vld [vmem:[%s5018_s23 + $0x1d4] sm:$0xf] }
  0xcc   : > { %v6463_v62 = vor.u32 %v5886_v48, %v5883_v42  ;;  %v6464_v47 = vor.u32 %v5892_v54, %v5889_v19  ;;  %v1032_v18 = vunpack.c.l.b16 %v706_v56  ;;  %v689_v3 = vpack.c.bf16 %v535_v12, %v535_v12  ;;  %v4267_v19 = vld [vmem:[%s5018_s23 + $0xe4] sm:$0xf]  ;;  %v3260_v54 = vld [vmem:[%s5018_s23 + $0xe8] sm:$0xf0]  ;;  %v3380_v6 = vld [vmem:[%s5018_s23 + $0x1d8] sm:$0xf0] }
  0xcd   : > { %v705_v39 = vpack.c.bf16 %v631_v36, %v631_v36  ;;  %v691_v33 = vpack.c.bf16 %v547_v46, %v547_v46  ;;  %v6465_v21 = vor.u32 %v5898_v7, %v5895_v22  ;;  %v3335_v63 = vor.u32 %v4285_v44, %v3332_v11  ;;  %v4281_v44 = vld [vmem:[%s5018_s23 + $0x154] sm:$0xf]  ;;  %v4263_v56 = vld [vmem:[%s5018_s23 + $0xc4] sm:$0xf]  ;;  %v3244_v36 = vld [vmem:[%s5018_s23 + $0xc8] sm:$0xf0] }
  0xce   : > { %2551 = vmatpush.bf16.msrb.mxu2 %v6463_v62  ;;  %2564 = vmatpush.bf16.msrb.mxu3 %v6464_v47  ;;  %v3399_v26 = vor.u32 %v4301_v15, %v3396_v34  ;;  %v1047_v42 = vsel %vm1034_vm0, %v1030_v41, %v1014_v49  ;;  %v707_v48 = vpack.c.bf16 %v643_v61, %v643_v61  ;;  %v1015_v13 = vunpack.c.l.b16 %v689_v3  ;;  %v4247_v15 = vld [vmem:[%s5018_s23 + $0x44] sm:$0xf]  ;;  %v3180_v34 = vld [vmem:[%s5018_s23 + $0x48] sm:$0xf0]  ;;  %v3172_v3 = vld [vmem:[%s5018_s23 + $0x38] sm:$0xf0] }
  0xcf   : > { %2526 = vmatpush.bf16.msrb.mxu0 %v6465_v21  ;;  %v6466_v32 = vor.u32 %v5911_v37, %v5908_v52  ;;  %v6467_v9 = vor.u32 %v5942_v1, %v5945_v35  ;;  %v6021_v22 = vpack.c.b16 %v1047_v42, %v1047_v42  ;;  %v1049_v7 = vsel %vm1034_vm0, %v1032_v18, %v1016_v17  ;;  %v4299_v1 = vld [vmem:[%s5018_s23 + $0x1e4] sm:$0xf]  ;;  %v3388_v35 = vld [vmem:[%s5018_s23 + $0x1e8] sm:$0xf0]  ;;  %v4245_v18 = vld [vmem:[%s5018_s23 + $0x34] sm:$0xf] }
  0xd0   : > { %v1031_v51 = vunpack.c.l.b16 %v705_v39  ;;  %v6468_v2 = vor.u32 %v5955_v31, %v5958_v8  ;;  %v6029_v16 = vpack.c.b16 %v1049_v7, %v1049_v7  ;;  %v1017_v52 = vunpack.c.l.b16 %v691_v33  ;;  %v4279_v46 = vld [vmem:[%s5018_s23 + $0x144] sm:$0xf]  ;;  %v3308_v49 = vld [vmem:[%s5018_s23 + $0x148] sm:$0xf0]  ;;  %v4261_v39 = vld [vmem:[%s5018_s23 + $0xb4] sm:$0xf] }
  0xd1   : > { %2539 = vmatpush.bf16.msrb.mxu1 %v6466_v32  ;;  %v1033_v37 = vunpack.c.l.b16 %v707_v48  ;;  %v6469_v43 = vor.u32 %v5917_v59, %v5914_v40  ;;  %v6470_v57 = vor.u32 %v5932_v29, %v5929_v28  ;;  %v3199_v8 = vor.u32 %v4251_v20, %v3196_v60  ;;  %v4265_v28 = vld [vmem:[%s5018_s23 + $0xd4] sm:$0xf]  ;;  %v4295_v41 = vld [vmem:[%s5018_s23 + $0x1c4] sm:$0xf]  ;;  %v3372_v17 = vld [vmem:[%s5018_s23 + $0x1c8] sm:$0xf0] }
  0xd2   : > { %v1048_v31 = vsel %vm1034_vm0, %v1031_v51, %v1015_v13  ;;  %v3263_v27 = vor.u32 %v4267_v19, %v3260_v54  ;;  %v3327_v59 = vor.u32 %v4283_v45, %v3324_v58  ;;  %2527 = vmatmul.bf16.vlgmr.msrb.gmra.mxu0 %v6021_v22  ;;  %v3391_v38 = vor.u32 %v4299_v1, %v3388_v35  ;;  %v3236_v20 = vld [vmem:[%s5018_s23 + $0xb8] sm:$0xf0]  ;;  %v4277_v21 = vld [vmem:[%s5018_s23 + $0x134] sm:$0xf]  ;;  %v4243_v54 = vld [vmem:[%s5018_s23 + $0x24] sm:$0xf] }
  0xd3   : > { %2571 = vmatpush.bf16.msra.mxu0 %v6467_v9  ;;  %2552 = vmatpush.bf16.msrb.mxu2 %v6469_v43  ;;  %v6040_v25 = vpack.c.b16 %v1048_v31, %v1048_v31  ;;  %v1050_v40 = vsel %vm1034_vm0, %v1033_v37, %v1017_v52  ;;  %v3191_v55 = vor.u32 %v4249_v0, %v3188_v5  ;;  %v3364_v42 = vld [vmem:[%s5018_s23 + $0x1b8] sm:$0xf0]  ;;  %v3164_v32 = vld [vmem:[%s5018_s23 + $0x28] sm:$0xf0]  ;;  %v4259_v9 = vld [vmem:[%s5018_s23 + $0xa4] sm:$0xf] }
  0xd4   : > { %2565 = vmatpush.bf16.msrb.mxu3 %v6470_v57  ;;  %v6047_v29 = vpack.c.b16 %v1050_v40, %v1050_v40  ;;  %v3255_v14 = vor.u32 %v4265_v28, %v3252_v10  ;;  %v3319_v11 = vor.u32 %v4281_v44, %v3316_v50  ;;  %v3383_v12 = vor.u32 %v4297_v23, %v3380_v6  ;;  %v3228_v13 = vld [vmem:[%s5018_s23 + $0xa8] sm:$0xf0]  ;;  %v4275_v51 = vld [vmem:[%s5018_s23 + $0x124] sm:$0xf]  ;;  %v4241_v35 = vld [vmem:[%s5018_s23 + $0x14] sm:$0xf] }
  0xd5   : > { %2584 = vmatpush.bf16.msra.mxu1 %v6468_v2  ;;  %v3183_v61 = vor.u32 %v4247_v15, %v3180_v34  ;;  %v3247_v62 = vor.u32 %v4263_v56, %v3244_v36  ;;  %v3311_v47 = vor.u32 %v4279_v46, %v3308_v49  ;;  %v3375_v33 = vor.u32 %v4295_v41, %v3372_v17  ;;  %v3292_v45 = vld [vmem:[%s5018_s23 + $0x128] sm:$0xf0]  ;;  %v4291_v58 = vld [vmem:[%s5018_s23 + $0x1a4] sm:$0xf]  ;;  %v3156_v43 = vld [vmem:[%s5018_s23 + $0x18] sm:$0xf0] }
  0xd6   : > { %2553 = vmatmul.bf16.vlgmr.msrb.gmra.mxu2 %v6029_v16  ;;  %2540 = vmatmul.bf16.vlgmr.msrb.gmra.mxu1 %v6040_v25  ;;  %v3175_v48 = vor.u32 %v4245_v18, %v3172_v3  ;;  %v3239_v60 = vor.u32 %v4261_v39, %v3236_v20  ;;  %v3356_v2 = vld [vmem:[%s5018_s23 + $0x1a8] sm:$0xf0]  ;;  %v3167_v52 = vor.u32 %v4243_v54, %v3164_v32  ;;  %v4257_v57 = vld [vmem:[%s5018_s23 + $0x94] sm:$0xf]  ;;  %v3284_v40 = vld [vmem:[%s5018_s23 + $0x118] sm:$0xf0] }
  0xd7   : > { %2597 = vmatpush.bf16.msra.mxu2 %v3335_v63  ;;  %2566 = vmatmul.bf16.vlgmr.msrb.gmra.mxu3 %v6047_v29  ;;  %v3300_v63 = vld [vmem:[%s5018_s23 + $0x138] sm:$0xf0]  ;;  %v3231_v37 = vor.u32 %v4259_v9, %v3228_v13  ;;  %v3295_v1 = vor.u32 %v4275_v51, %v3292_v45  ;;  %v3359_v31 = vor.u32 %v4291_v58, %v3356_v2  ;;  %v4239_v28 = vld [vmem:[%s5018_s23 + $0x4] sm:$0xf]  ;;  %v3212_v23 = vld [vmem:[%s5018_s23 + $0x88] sm:$0xf0] }
  0xd8   : > { %2610 = vmatpush.bf16.msra.mxu3 %v3399_v26  ;;  %2572 = vmatpush.bf16.msra.mxu0 %v3199_v8  ;;  %v4293_v26 = vld [vmem:[%s5018_s23 + $0x1b4] sm:$0xf]  ;;  %v3303_v19 = vor.u32 %v4277_v21, %v3300_v63  ;;  %v3220_v8 = vld [vmem:[%s5018_s23 + $0x98] sm:$0xf0]  ;;  %v3159_v5 = vor.u32 %v4241_v35, %v3156_v43  ;;  %v4255_v50 = vld [vmem:[%s5018_s23 + $0x84] sm:$0xf] }
  0xd9   : > { %2585 = vmatpush.bf16.msra.mxu1 %v3263_v27  ;;  %v3367_v7 = vor.u32 %v4293_v26, %v3364_v42  ;;  %v4273_v27 = vld [vmem:[%s5018_s23 + $0x114] sm:$0xf]  ;;  %v3348_v0 = vld [vmem:[%s5018_s23 + $0x198] sm:$0xf0]  ;;  %v3223_v10 = vor.u32 %v4257_v57, %v3220_v8  ;;  %v4271_v6 = vld [vmem:[%s5018_s23 + $0x104] sm:$0xf]  ;;  %v3215_v17 = vor.u32 %v4255_v50, %v3212_v23 }
  0xda   : > { %v3287_v44 = vor.u32 %v4273_v27, %v3284_v40  ;;  %v3340_v15 = vld [vmem:[%s5018_s23 + $0x188] sm:$0xf0]  ;;  %v4317_v34 = vld [vmem:[%s5018_s23 + $0x274] sm:$0xf]  ;;  %v3460_v56 = vld [vmem:[%s5018_s23 + $0x278] sm:$0xf0] }
  0xdb   : > { %2598 = vmatpush.bf16.msra.mxu2 %v3327_v59  ;;  %v4289_v59 = vld [vmem:[%s5018_s23 + $0x194] sm:$0xf]  ;;  %v3524_v46 = vld [vmem:[%s5018_s23 + $0x2f8] sm:$0xf0]  ;;  %v3463_v3 = vor.u32 %v4317_v34, %v3460_v56  ;;  %v4315_v20 = vld [vmem:[%s5018_s23 + $0x264] sm:$0xf] }
  0xdc   : > { %2611 = vmatpush.bf16.msra.mxu3 %v3391_v38  ;;  %2573 = vmatpush.bf16.msra.mxu0 %v3191_v55  ;;  %v3148_v38 = vld [vmem:[%s5018_s23 + $0x8] sm:$0xf0]  ;;  %v3351_v55 = vor.u32 %v4289_v59, %v3348_v0  ;;  %v4349_v49 = vld [vmem:[%s5018_s23 + $0x374] sm:$0xf]  ;;  %v3588_v41 = vld [vmem:[%s5018_s23 + $0x378] sm:$0xf0] }
  0xdd   : > { %2586 = vmatpush.bf16.msra.mxu1 %v3255_v14  ;;  %v3276_v14 = vld [vmem:[%s5018_s23 + $0x108] sm:$0xf0]  ;;  %v3151_v36 = vor.u32 %v4239_v28, %v3148_v38  ;;  %v4331_v63 = vld [vmem:[%s5018_s23 + $0x2e4] sm:$0xf]  ;;  %v4313_v13 = vld [vmem:[%s5018_s23 + $0x254] sm:$0xf] }
  0xde   : > { %v3452_v21 = vld [vmem:[%s5018_s23 + $0x268] sm:$0xf0]  ;;  %v3444_v51 = vld [vmem:[%s5018_s23 + $0x258] sm:$0xf0]  ;;  %v4329_v45 = vld [vmem:[%s5018_s23 + $0x2d4] sm:$0xf] }
  0xdf   : > { %2599 = vmatpush.bf16.msra.mxu2 %v3319_v11  ;;  %v4287_v11 = vld [vmem:[%s5018_s23 + $0x184] sm:$0xf]  ;;  %v3516_v42 = vld [vmem:[%s5018_s23 + $0x2e8] sm:$0xf0]  ;;  %v3455_v32 = vor.u32 %v4315_v20, %v3452_v21  ;;  %v3508_v2 = vld [vmem:[%s5018_s23 + $0x2d8] sm:$0xf0]  ;;  %v3447_v43 = vor.u32 %v4313_v13, %v3444_v51 }
  0xe0   : > { %2612 = vmatpush.bf16.msra.mxu3 %v3383_v12  ;;  %2574 = vmatpush.bf16.msra.mxu0 %v3183_v61  ;;  %v4333_v12 = vld [vmem:[%s5018_s23 + $0x2f4] sm:$0xf]  ;;  %v3279_v61 = vor.u32 %v4271_v6, %v3276_v14  ;;  %v3343_v18 = vor.u32 %v4287_v11, %v3340_v15  ;;  %v3644_v54 = vld [vmem:[%s5018_s23 + $0x3e8] sm:$0xf0]  ;;  %v3519_v9 = vor.u32 %v4331_v63, %v3516_v42  ;;  %v3636_v35 = vld [vmem:[%s5018_s23 + $0x3d8] sm:$0xf0] }
  0xe1   : > { %2587 = vmatpush.bf16.msra.mxu1 %v3247_v62  ;;  %v4365_v62 = vld [vmem:[%s5018_s23 + $0x3f4] sm:$0xf]  ;;  %v3527_v39 = vor.u32 %v4333_v12, %v3524_v46  ;;  %v3511_v57 = vor.u32 %v4329_v45, %v3508_v2  ;;  %v3436_v8 = vld [vmem:[%s5018_s23 + $0x248] sm:$0xf0]  ;;  %v4327_v27 = vld [vmem:[%s5018_s23 + $0x2c4] sm:$0xf] }
  0xe2   : > { %v3500_v40 = vld [vmem:[%s5018_s23 + $0x2c8] sm:$0xf0]  ;;  %v4359_v0 = vld [vmem:[%s5018_s23 + $0x3c4] sm:$0xf]  ;;  %v4325_v50 = vld [vmem:[%s5018_s23 + $0x2b4] sm:$0xf] }
  0xe3   : > { %2600 = vmatpush.bf16.msra.mxu2 %v3311_v47  ;;  %v3652_v47 = vld [vmem:[%s5018_s23 + $0x3f8] sm:$0xf0]  ;;  %v3564_v59 = vld [vmem:[%s5018_s23 + $0x348] sm:$0xf0]  ;;  %v3503_v28 = vor.u32 %v4327_v27, %v3500_v40  ;;  %v4357_v11 = vld [vmem:[%s5018_s23 + $0x3b4] sm:$0xf] }
  0xe4   : > { %2613 = vmatpush.bf16.msra.mxu3 %v3375_v33  ;;  %2575 = vmatpush.bf16.msra.mxu0 %v3175_v48  ;;  %v3591_v33 = vor.u32 %v4349_v49, %v3588_v41  ;;  %v3655_v26 = vor.u32 %v4365_v62, %v3652_v47  ;;  %v4347_v48 = vld [vmem:[%s5018_s23 + $0x364] sm:$0xf]  ;;  %v3492_v6 = vld [vmem:[%s5018_s23 + $0x2b8] sm:$0xf0]  ;;  %v3420_v46 = vld [vmem:[%s5018_s23 + $0x228] sm:$0xf0] }
  0xe5   : > { %2588 = vmatpush.bf16.msra.mxu1 %v3239_v60  ;;  %v3580_v60 = vld [vmem:[%s5018_s23 + $0x368] sm:$0xf0]  ;;  %v3556_v14 = vld [vmem:[%s5018_s23 + $0x338] sm:$0xf0]  ;;  %v3495_v56 = vor.u32 %v4325_v50, %v3492_v6  ;;  %v4323_v49 = vld [vmem:[%s5018_s23 + $0x2a4] sm:$0xf] }
  0xe6   : > { %v3620_v15 = vld [vmem:[%s5018_s23 + $0x3b8] sm:$0xf0]  ;;  %v3548_v62 = vld [vmem:[%s5018_s23 + $0x328] sm:$0xf0]  ;;  %v4355_v47 = vld [vmem:[%s5018_s23 + $0x3a4] sm:$0xf] }
  0xe7   : > { %2601 = vmatpush.bf16.msra.mxu2 %v3303_v19  ;;  %v4363_v19 = vld [vmem:[%s5018_s23 + $0x3e4] sm:$0xf]  ;;  %v3623_v41 = vor.u32 %v4357_v11, %v3620_v15  ;;  %v4305_v20 = vld [vmem:[%s5018_s23 + $0x214] sm:$0xf]  ;;  %v3412_v21 = vld [vmem:[%s5018_s23 + $0x218] sm:$0xf0] }
  0xe8   : > { %2614 = vmatpush.bf16.msra.mxu3 %v3367_v7  ;;  %2576 = vmatpush.bf16.msra.mxu0 %v3167_v52  ;;  %v3583_v7 = vor.u32 %v4347_v48, %v3580_v60  ;;  %v3647_v58 = vor.u32 %v4363_v19, %v3644_v54  ;;  %v4345_v52 = vld [vmem:[%s5018_s23 + $0x354] sm:$0xf]  ;;  %v3476_v42 = vld [vmem:[%s5018_s23 + $0x298] sm:$0xf0]  ;;  %v4319_v45 = vld [vmem:[%s5018_s23 + $0x284] sm:$0xf] }
  0xe9   : > { %2589 = vmatpush.bf16.msra.mxu1 %v3231_v37  ;;  %v3572_v37 = vld [vmem:[%s5018_s23 + $0x358] sm:$0xf0]  ;;  %v4321_v63 = vld [vmem:[%s5018_s23 + $0x294] sm:$0xf]  ;;  %v4335_v2 = vld [vmem:[%s5018_s23 + $0x304] sm:$0xf] }
  0xea   : > { %v4337_v48 = vld [vmem:[%s5018_s23 + $0x314] sm:$0xf]  ;;  %v3540_v60 = vld [vmem:[%s5018_s23 + $0x318] sm:$0xf0]  ;;  %v3479_v13 = vor.u32 %v4321_v63, %v3476_v42  ;;  %v3708_v50 = vld [vmem:[%s5018_s23 + $0x468] sm:$0xf0] }
  0xeb   : > { %2602 = vmatpush.bf16.msra.mxu2 %v3295_v1  ;;  %v4361_v1 = vld [vmem:[%s5018_s23 + $0x3d4] sm:$0xf]  ;;  %v3604_v54 = vld [vmem:[%s5018_s23 + $0x398] sm:$0xf0]  ;;  %v3543_v51 = vor.u32 %v4337_v48, %v3540_v60  ;;  %v3836_v11 = vld [vmem:[%s5018_s23 + $0x568] sm:$0xf0] }
  0xec   : > { %2615 = vmatpush.bf16.msra.mxu3 %v3359_v31  ;;  %2577 = vmatpush.bf16.msra.mxu0 %v3159_v5  ;;  %v3575_v31 = vor.u32 %v4345_v52, %v3572_v37  ;;  %v4353_v19 = vld [vmem:[%s5018_s23 + $0x394] sm:$0xf]  ;;  %v3532_v37 = vld [vmem:[%s5018_s23 + $0x308] sm:$0xf0]  ;;  %v3780_v27 = vld [vmem:[%s5018_s23 + $0x4f8] sm:$0xf0] }
  0xed   : > { %2590 = vmatpush.bf16.msra.mxu1 %v3223_v10  ;;  %v4309_v10 = vld [vmem:[%s5018_s23 + $0x234] sm:$0xf]  ;;  %v3607_v52 = vor.u32 %v4353_v19, %v3604_v54  ;;  %v3844_v40 = vld [vmem:[%s5018_s23 + $0x578] sm:$0xf0]  ;;  %v6474_v60 = vld [vmem:[#allocation27_spill] sm:$0xff] }
  0xee   : > { %v3892_v63 = vld [vmem:[%s5018_s23 + $0x5d8] sm:$0xf0] }
  0xef   : > { %2603 = vmatpush.bf16.msra.mxu2 %v3287_v44  ;;  %v3428_v44 = vld [vmem:[%s5018_s23 + $0x238] sm:$0xf0] }
  0xf0   : > { %2616 = vmatpush.bf16.msra.mxu3 %v3351_v55  ;;  %2578 = vmatpush.bf16.msra.mxu0 %v3151_v36  ;;  %v4341_v55 = vld [vmem:[%s5018_s23 + $0x334] sm:$0xf]  ;;  %v3431_v34 = vor.u32 %v4309_v10, %v3428_v44  ;;  %v4307_v36 = vld [vmem:[%s5018_s23 + $0x224] sm:$0xf]  ;;  %v6473_v42 = vld [vmem:[#allocation26_spill] sm:$0xff] }
  0xf1   : > { %2591 = vmatpush.bf16.msra.mxu1 %v3215_v17  ;;  %v3559_v12 = vor.u32 %v4341_v55, %v3556_v14  ;;  %v3484_v17 = vld [vmem:[%s5018_s23 + $0x2a8] sm:$0xf0]  ;;  %v4379_v44 = vld [vmem:[%s5018_s23 + $0x464] sm:$0xf] }
  0xf2   : > { %v3772_v55 = vld [vmem:[%s5018_s23 + $0x4e8] sm:$0xf0]  ;;  %v4411_v14 = vld [vmem:[%s5018_s23 + $0x564] sm:$0xf] }
  0xf3   : > { %2604 = vmatpush.bf16.msra.mxu2 %v3279_v61  ;;  %2579 = vmatmul.bf16.vlgmr.msra.gmra.mxu0 %v5422_v30  ;;  %v3639_v30 = vor.u32 %v4361_v1, %v3636_v35  ;;  %v4339_v61 = vld [vmem:[%s5018_s23 + $0x324] sm:$0xf]  ;;  %v3596_v35 = vld [vmem:[%s5018_s23 + $0x388] sm:$0xf0] }
  0xf4   : > { %2617 = vmatpush.bf16.msra.mxu3 %v3343_v18  ;;  %2623 = vmatpush.bf16.msrb.mxu0 %v3463_v3  ;;  %v3612_v18 = vld [vmem:[%s5018_s23 + $0x3a8] sm:$0xf0]  ;;  %v3423_v3 = vor.u32 %v4307_v36, %v3420_v46  ;;  %v4351_v1 = vld [vmem:[%s5018_s23 + $0x384] sm:$0xf] }
  0xf5   : > { %2636 = vmatpush.bf16.msrb.mxu1 %v3527_v39  ;;  %v3487_v39 = vor.u32 %v4323_v49, %v3484_v17  ;;  %v4377_v17 = vld [vmem:[%s5018_s23 + $0x454] sm:$0xf] }
  0xf6   : > { %2605 = vmatmul.bf16.vlgmr.msra.gmra.mxu2 %v5405_v24  ;;  %2592 = vmatmul.bf16.vlgmr.msra.gmra.mxu1 %v5509_v53  ;;  %v4311_v24 = vld [vmem:[%s5018_s23 + $0x244] sm:$0xf]  ;;  %v3628_v53 = vld [vmem:[%s5018_s23 + $0x3c8] sm:$0xf0] }
  0xf7   : > { %2649 = vmatpush.bf16.msrb.mxu2 %v3591_v33  ;;  %2618 = vmatmul.bf16.vlgmr.msra.gmra.mxu3 %v5437_v4  ;;  %v4343_v4 = vld [vmem:[%s5018_s23 + $0x344] sm:$0xf]  ;;  %v3439_v5 = vor.u32 %v4311_v24, %v3436_v8  ;;  %v3631_v23 = vor.u32 %v4359_v0, %v3628_v53  ;;  %v3551_v33 = vor.u32 %v4339_v61, %v3548_v62  ;;  %v4429_v0 = vld [vmem:[%s5018_s23 + $0x5f4] sm:$0xf]  ;;  %v3908_v53 = vld [vmem:[%s5018_s23 + $0x5f8] sm:$0xf0] }
  0xf8   : > { %2662 = vmatpush.bf16.msrb.mxu3 %v3655_v26  ;;  %2624 = vmatpush.bf16.msrb.mxu0 %v3455_v32  ;;  %v3567_v38 = vor.u32 %v4343_v4, %v3564_v59  ;;  %v3615_v26 = vor.u32 %v4355_v47, %v3612_v18  ;;  %v3415_v32 = vor.u32 %v4305_v20, %v3412_v21  ;;  %v3700_v61 = vld [vmem:[%s5018_s23 + $0x458] sm:$0xf0]  ;;  %v4393_v62 = vld [vmem:[%s5018_s23 + $0x4d4] sm:$0xf] }
  0xf9   : > { %2637 = vmatpush.bf16.msrb.mxu1 %v3519_v9  ;;  %v4303_v9 = vld [vmem:[%s5018_s23 + $0x204] sm:$0xf]  ;;  %v3535_v59 = vor.u32 %v4335_v2, %v3532_v37  ;;  %v3911_v6 = vor.u32 %v4429_v0, %v3908_v53  ;;  %v3828_v20 = vld [vmem:[%s5018_s23 + $0x558] sm:$0xf0]  ;;  %v4425_v21 = vld [vmem:[%s5018_s23 + $0x5d4] sm:$0xf]  ;;  %v3703_v48 = vor.u32 %v4377_v17, %v3700_v61 }
  0xfa   : > { %v3884_v37 = vld [vmem:[%s5018_s23 + $0x5c8] sm:$0xf0]  ;;  %v3812_v0 = vld [vmem:[%s5018_s23 + $0x538] sm:$0xf0]  ;;  %v4421_v53 = vld [vmem:[%s5018_s23 + $0x5b4] sm:$0xf] }
  0xfb   : > { %2650 = vmatpush.bf16.msrb.mxu2 %v3583_v7  ;;  %v3404_v7 = vld [vmem:[%s5018_s23 + $0x208] sm:$0xf0]  ;;  %v4369_v61 = vld [vmem:[%s5018_s23 + $0x414] sm:$0xf] }
  0xfc   : > { %2663 = vmatpush.bf16.msrb.mxu3 %v3647_v58  ;;  %2625 = vmatpush.bf16.msrb.mxu0 %v3447_v43  ;;  %v3468_v58 = vld [vmem:[%s5018_s23 + $0x288] sm:$0xf0]  ;;  %v4381_v43 = vld [vmem:[%s5018_s23 + $0x474] sm:$0xf]  ;;  %v3407_v8 = vor.u32 %v4303_v9, %v3404_v7  ;;  %v4391_v7 = vld [vmem:[%s5018_s23 + $0x4c4] sm:$0xf] }
  0xfd   : > { %2638 = vmatpush.bf16.msrb.mxu1 %v3511_v57  ;;  %v3716_v57 = vld [vmem:[%s5018_s23 + $0x478] sm:$0xf0]  ;;  %v3471_v4 = vor.u32 %v4319_v45, %v3468_v58  ;;  %v3692_v9 = vld [vmem:[%s5018_s23 + $0x448] sm:$0xf0]  ;;  %v4407_v45 = vld [vmem:[%s5018_s23 + $0x544] sm:$0xf] }
  0xfe   : > { %v3820_v58 = vld [vmem:[%s5018_s23 + $0x548] sm:$0xf0] }
  0xff   : > { %2651 = vmatpush.bf16.msrb.mxu2 %v3575_v31  ;;  %v4397_v31 = vld [vmem:[%s5018_s23 + $0x4f4] sm:$0xf] }
 0x100   : > { %2664 = vmatpush.bf16.msrb.mxu3 %v3639_v30  ;;  %2626 = vmatpush.bf16.msrb.mxu0 %v3439_v5  ;;  %v4413_v30 = vld [vmem:[%s5018_s23 + $0x574] sm:$0xf]  ;;  %v3599_v5 = vor.u32 %v4351_v1, %v3596_v35 }
 0x101   : > { %2639 = vmatpush.bf16.msrb.mxu1 %v3503_v28  ;;  %v3719_v28 = vor.u32 %v4381_v43, %v3716_v57  ;;  %v3847_v10 = vor.u32 %v4413_v30, %v3844_v40  ;;  %v4389_v30 = vld [vmem:[%s5018_s23 + $0x4b4] sm:$0xf] }
 0x103   : > { %2652 = vmatpush.bf16.msrb.mxu2 %v3567_v38  ;;  %v6168_v24 = vpop.f32.mrf.mxu0  ;;  %v3783_v38 = vor.u32 %v4397_v31, %v3780_v27  ;;  %v3823_v31 = vor.u32 %v4407_v45, %v3820_v58  ;;  %v3684_v27 = vld [vmem:[%s5018_s23 + $0x438] sm:$0xf0]  ;;  %v3788_v45 = vld [vmem:[%s5018_s23 + $0x508] sm:$0xf0]  ;;  %v4415_v58 = vld [vmem:[%s5018_s23 + $0x584] sm:$0xf] }
 0x104   : > { %2665 = vmatpush.bf16.msrb.mxu3 %v3631_v23  ;;  %2627 = vmatpush.bf16.msrb.mxu0 %v3431_v34  ;;  %v4395_v23 = vld [vmem:[%s5018_s23 + $0x4e4] sm:$0xf] }
 0x105   : > { %2640 = vmatpush.bf16.msrb.mxu1 %v3495_v56  ;;  %v4427_v34 = vld [vmem:[%s5018_s23 + $0x5e4] sm:$0xf]  ;;  %v3900_v56 = vld [vmem:[%s5018_s23 + $0x5e8] sm:$0xf0]  ;;  %v3775_v49 = vor.u32 %v4395_v23, %v3772_v55 }
 0x106   : > { %v3903_v18 = vor.u32 %v4427_v34, %v3900_v56  ;;  %v4387_v23 = vld [vmem:[%s5018_s23 + $0x4a4] sm:$0xf]  ;;  %v3740_v55 = vld [vmem:[%s5018_s23 + $0x4a8] sm:$0xf0] }
 0x107   : > { %2653 = vmatpush.bf16.msrb.mxu2 %v3559_v12  ;;  %v6181_v15 = vpop.f32.mrf.mxu2  ;;  %v3711_v12 = vor.u32 %v4379_v44, %v3708_v50  ;;  %v4371_v44 = vld [vmem:[%s5018_s23 + $0x424] sm:$0xf]  ;;  %v3676_v50 = vld [vmem:[%s5018_s23 + $0x428] sm:$0xf0] }
 0x108   : > { %2666 = vmatpush.bf16.msrb.mxu3 %v3623_v41  ;;  %2628 = vmatpush.bf16.msrb.mxu0 %v3423_v3  ;;  %v6187_v46 = vpop.f32.mrf.mxu3  ;;  %v3839_v41 = vor.u32 %v4411_v14, %v3836_v11  ;;  %v6471_v3 = vld [vmem:[#allocation24_spill] sm:$0xff]  ;;  %v4403_v14 = vld [vmem:[%s5018_s23 + $0x524] sm:$0xf] }
 0x109   : > { %2641 = vmatpush.bf16.msrb.mxu1 %v3487_v39  ;;  %v6185_v36 = vpop.f32.mrf.mxu1  ;;  %v3764_v39 = vld [vmem:[%s5018_s23 + $0x4d8] sm:$0xf0]  ;;  %v3804_v11 = vld [vmem:[%s5018_s23 + $0x528] sm:$0xf0]  ;;  %v4419_v34 = vld [vmem:[%s5018_s23 + $0x5a4] sm:$0xf] }
 0x10a   : > { %v3767_v19 = vor.u32 %v4393_v62, %v3764_v39  ;;  %v3868_v56 = vld [vmem:[%s5018_s23 + $0x5a8] sm:$0xf0]  ;;  %v3807_v17 = vor.u32 %v4403_v14, %v3804_v11  ;;  %v3668_v62 = vld [vmem:[%s5018_s23 + $0x418] sm:$0xf0]  ;;  %v4401_v39 = vld [vmem:[%s5018_s23 + $0x514] sm:$0xf] }
 0x10b   : > { %2654 = vmatpush.bf16.msrb.mxu2 %v3551_v33  ;;  %v2374_v47 = vpop.f32.mrf.mxu0  ;;  %v4409_v33 = vld [vmem:[%s5018_s23 + $0x554] sm:$0xf]  ;;  %v4028_v14 = vld [vmem:[%s5018_s23 + $0x6e8] sm:$0xf0]  ;;  %v4475_v11 = vld [vmem:[%s5018_s23 + $0x764] sm:$0xf] }
 0x10c   : > { %2667 = vmatpush.bf16.msrb.mxu3 %v3615_v26  ;;  %2629 = vmatpush.bf16.msrb.mxu0 %v3415_v32  ;;  %v6472_v26 = vld [vmem:[#allocation25_spill] sm:$0xff]  ;;  %v3831_v54 = vor.u32 %v4409_v33, %v3828_v20  ;;  %v4375_v32 = vld [vmem:[%s5018_s23 + $0x444] sm:$0xf]  ;;  %v3796_v33 = vld [vmem:[%s5018_s23 + $0x518] sm:$0xf0] }
 0x10d   : > { %2642 = vmatpush.bf16.msrb.mxu1 %v3479_v13  ;;  %v3895_v13 = vor.u32 %v4425_v21, %v3892_v63  ;;  %v3695_v1 = vor.u32 %v4375_v32, %v3692_v9  ;;  %v4385_v47 = vld [vmem:[%s5018_s23 + $0x494] sm:$0xf]  ;;  %v3799_v32 = vor.u32 %v4401_v39, %v3796_v33  ;;  %v4383_v9 = vld [vmem:[%s5018_s23 + $0x484] sm:$0xf]  ;;  %v4020_v33 = vld [vmem:[%s5018_s23 + $0x6d8] sm:$0xf0] }
 0x10e   : > { %v4417_v63 = vld [vmem:[%s5018_s23 + $0x594] sm:$0xf] }
 0x10f   : > { %2655 = vmatpush.bf16.msrb.mxu2 %v3543_v51  ;;  %v3756_v51 = vld [vmem:[%s5018_s23 + $0x4c8] sm:$0xf0]  ;;  %v2400_v2 = vpop.f32.mrf.mxu2 }
 0x110   : > { %2668 = vmatpush.bf16.msrb.mxu3 %v3607_v52  ;;  %2630 = vmatpush.bf16.msrb.mxu0 %v3407_v8  ;;  %v4423_v52 = vld [vmem:[%s5018_s23 + $0x5c4] sm:$0xf]  ;;  %v2413_v43 = vpop.f32.mrf.mxu3  ;;  %v3759_v57 = vor.u32 %v4391_v7, %v3756_v51  ;;  %v4373_v8 = vld [vmem:[%s5018_s23 + $0x434] sm:$0xf]  ;;  %v3724_v7 = vld [vmem:[%s5018_s23 + $0x488] sm:$0xf0] }
 0x111   : > { %2643 = vmatpush.bf16.msrb.mxu1 %v3471_v4  ;;  %v2387_v35 = vpop.f32.mrf.mxu1  ;;  %v3887_v40 = vor.u32 %v4423_v52, %v3884_v37  ;;  %v3748_v4 = vld [vmem:[%s5018_s23 + $0x4b8] sm:$0xf0]  ;;  %v3852_v2 = vld [vmem:[%s5018_s23 + $0x588] sm:$0xf0]  ;;  %v4445_v52 = vld [vmem:[%s5018_s23 + $0x674] sm:$0xf] }
 0x112   : > { %v3972_v37 = vld [vmem:[%s5018_s23 + $0x678] sm:$0xf0] }
 0x113   : > { %2656 = vmatpush.bf16.msrb.mxu2 %v3535_v59  ;;  %2631 = vmatmul.bf16.vlgmr.msrb.gmra.mxu0 %v6472_v26  ;;  %v4405_v59 = vld [vmem:[%s5018_s23 + $0x534] sm:$0xf]  ;;  %v3860_v26 = vld [vmem:[%s5018_s23 + $0x598] sm:$0xf0] }
 0x114   : > { %2669 = vmatpush.bf16.msrb.mxu3 %v3599_v5  ;;  %2675 = vmatpush.bf16.msra.mxu0 %v3719_v28  ;;  %v3876_v5 = vld [vmem:[%s5018_s23 + $0x5b8] sm:$0xf0]  ;;  %v3687_v28 = vor.u32 %v4373_v8, %v3684_v27  ;;  %v3863_v51 = vor.u32 %v4417_v63, %v3860_v26  ;;  %v4473_v63 = vld [vmem:[%s5018_s23 + $0x754] sm:$0xf] }
 0x115   : > { %2688 = vmatpush.bf16.msra.mxu1 %v3783_v38  ;;  %v3751_v38 = vor.u32 %v4389_v30, %v3748_v4  ;;  %v4100_v8 = vld [vmem:[%s5018_s23 + $0x778] sm:$0xf0]  ;;  %v3727_v30 = vor.u32 %v4383_v9, %v3724_v7  ;;  %v4493_v4 = vld [vmem:[%s5018_s23 + $0x7f4] sm:$0xf]  ;;  %v6478_v7 = vld [vmem:[#allocation31_spill] sm:$0xff] }
 0x116   : > { %2657 = vmatmul.bf16.vlgmr.msrb.gmra.mxu2 %v6471_v3  ;;  %2644 = vmatmul.bf16.vlgmr.msrb.gmra.mxu1 %v6474_v60  ;;  %v3732_v3 = vld [vmem:[%s5018_s23 + $0x498] sm:$0xf0]  ;;  %v4367_v60 = vld [vmem:[%s5018_s23 + $0x404] sm:$0xf] }
 0x117   : > { %2701 = vmatpush.bf16.msra.mxu2 %v3847_v10  ;;  %2670 = vmatmul.bf16.vlgmr.msrb.gmra.mxu3 %v6473_v42  ;;  %v3815_v10 = vor.u32 %v4405_v59, %v3812_v0  ;;  %v6240_v42 = vld [vmem:[%s5028_s9] sm:$0x3]  ;;  %v4164_v59 = vld [vmem:[%s5018_s23 + $0x7f8] sm:$0xf0] }
 0x118   : > { %2714 = vmatpush.bf16.msra.mxu3 %v3911_v6  ;;  %2676 = vmatpush.bf16.msra.mxu0 %v3711_v12  ;;  %v3879_v6 = vor.u32 %v4421_v53, %v3876_v5  ;;  %v3679_v12 = vor.u32 %v4371_v44, %v3676_v50  ;;  %v966_v27 = vperm.slane %v6240_v42, 0  ;;  %v3855_v53 = vor.u32 %v4415_v58, %v3852_v2  ;;  %v3964_v44 = vld [vmem:[%s5018_s23 + $0x668] sm:$0xf0]  ;;  %v4459_v50 = vld [vmem:[%s5018_s23 + $0x6e4] sm:$0xf] }
 0x119   : > { %2689 = vmatpush.bf16.msra.mxu1 %v3775_v49  ;;  %v3975_v5 = vor.u32 %v4445_v52, %v3972_v37  ;;  %v4084_v26 = vld [vmem:[%s5018_s23 + $0x758] sm:$0xf0]  ;;  %v3948_v58 = vld [vmem:[%s5018_s23 + $0x648] sm:$0xf0]  ;;  %v4455_v2 = vld [vmem:[%s5018_s23 + $0x6c4] sm:$0xf] }
 0x11a   : > { %v4148_v9 = vld [vmem:[%s5018_s23 + $0x7d8] sm:$0xf0]  ;;  %v4012_v37 = vld [vmem:[%s5018_s23 + $0x6c8] sm:$0xf0] }
 0x11b   : > { %2702 = vmatpush.bf16.msra.mxu2 %v3839_v41  ;;  %v6225_v49 = vpop.f32.mrf.mxu0  ;;  %v3743_v41 = vor.u32 %v4387_v23, %v3740_v55  ;;  %v4167_v55 = vor.u32 %v4493_v4, %v4164_v59  ;;  %v4437_v59 = vld [vmem:[%s5018_s23 + $0x634] sm:$0xf] }
 0x11c   : > { %2715 = vmatpush.bf16.msra.mxu3 %v3903_v18  ;;  %2677 = vmatpush.bf16.msra.mxu0 %v3703_v48  ;;  %v3871_v18 = vor.u32 %v4419_v34, %v3868_v56  ;;  %v6235_v21 = vpop.f32.mrf.mxu2  ;;  %v3671_v48 = vor.u32 %v4369_v61, %v3668_v62  ;;  %v4092_v34 = vld [vmem:[%s5018_s23 + $0x768] sm:$0xf0]  ;;  %v2373_v56 = vadd.f32 %v6168_v24, %v966_v27 }
 0x11d   : > { %2690 = vmatpush.bf16.msra.mxu1 %v3767_v19  ;;  %v6233_v20 = vpop.f32.mrf.mxu1  ;;  %v3660_v19 = vld [vmem:[%s5018_s23 + $0x408] sm:$0xf0]  ;;  %v4031_v61 = vor.u32 %v4459_v50, %v4028_v14  ;;  %v4095_v62 = vor.u32 %v4475_v11, %v4092_v34  ;;  %v4132_v50 = vld [vmem:[%s5018_s23 + $0x7b8] sm:$0xf0]  ;;  %v4435_v11 = vld [vmem:[%s5018_s23 + $0x624] sm:$0xf] }
 0x11e   : > { %v3663_v43 = vor.u32 %v4367_v60, %v3660_v19  ;;  %v6475_v24 = vld [vmem:[#allocation28_spill] sm:$0xff]  ;;  %v2386_v60 = vadd.f32 %v6185_v36, %v2373_v56  ;;  %v6476_v19 = vld [vmem:[#allocation29_spill] sm:$0xff]  ;;  %v4439_v36 = vld [vmem:[%s5018_s23 + $0x644] sm:$0xf] }
 0x11f   : > { %2703 = vmatpush.bf16.msra.mxu2 %v3831_v54  ;;  %v3735_v54 = vor.u32 %v4385_v47, %v3732_v3  ;;  %v4441_v47 = vld [vmem:[%s5018_s23 + $0x654] sm:$0xf]  ;;  %v3951_v27 = vor.u32 %v4439_v36, %v3948_v58  ;;  %v3932_v34 = vld [vmem:[%s5018_s23 + $0x628] sm:$0xf0]  ;;  %v4451_v56 = vld [vmem:[%s5018_s23 + $0x6a4] sm:$0xf] }
 0x120   : > { %2716 = vmatpush.bf16.msra.mxu3 %v3895_v13  ;;  %2678 = vmatpush.bf16.msra.mxu0 %v3695_v1  ;;  %v4399_v13 = vld [vmem:[%s5018_s23 + $0x504] sm:$0xf]  ;;  %v4461_v1 = vld [vmem:[%s5018_s23 + $0x6f4] sm:$0xf] }
 0x121   : > { %2691 = vmatpush.bf16.msra.mxu1 %v3759_v57  ;;  %v6253_v35 = vpop.f32.mrf.mxu3  ;;  %v4036_v57 = vld [vmem:[%s5018_s23 + $0x6f8] sm:$0xf0]  ;;  %v4457_v3 = vld [vmem:[%s5018_s23 + $0x6d4] sm:$0xf] }
 0x123   : > { %2704 = vmatpush.bf16.msra.mxu2 %v3823_v31  ;;  %v4477_v31 = vld [vmem:[%s5018_s23 + $0x774] sm:$0xf]  ;;  %v2426_v0 = vpop.f32.mrf.mxu0 }
 0x124   : > { %2717 = vmatpush.bf16.msra.mxu3 %v3887_v40  ;;  %2679 = vmatpush.bf16.msra.mxu0 %v3687_v28  ;;  %v3791_v40 = vor.u32 %v4399_v13, %v3788_v45  ;;  %v4039_v28 = vor.u32 %v4461_v1, %v4036_v57  ;;  %v4087_v45 = vor.u32 %v4473_v63, %v4084_v26  ;;  %v4471_v1 = vld [vmem:[%s5018_s23 + $0x744] sm:$0xf]  ;;  %v3940_v0 = vld [vmem:[%s5018_s23 + $0x638] sm:$0xf0]  ;;  %v4449_v26 = vld [vmem:[%s5018_s23 + $0x694] sm:$0xf] }
 0x125   : > { %2692 = vmatpush.bf16.msra.mxu1 %v3751_v38  ;;  %v4103_v38 = vor.u32 %v4477_v31, %v4100_v8  ;;  %v2439_v23 = vpop.f32.mrf.mxu1  ;;  %v2399_v57 = vadd.f32 %v6181_v15, %v2386_v60  ;;  %v4487_v31 = vld [vmem:[%s5018_s23 + $0x7c4] sm:$0xf]  ;;  %v4140_v8 = vld [vmem:[%s5018_s23 + $0x7c8] sm:$0xf0]  ;;  %v3924_v63 = vld [vmem:[%s5018_s23 + $0x618] sm:$0xf0] }
 0x126   : > { %v4143_v15 = vor.u32 %v4487_v31, %v4140_v8  ;;  %v3988_v60 = vld [vmem:[%s5018_s23 + $0x698] sm:$0xf0]  ;;  %v4479_v8 = vld [vmem:[%s5018_s23 + $0x784] sm:$0xf] }
 0x127   : > { %2705 = vmatpush.bf16.msra.mxu2 %v3815_v10  ;;  %v4443_v10 = vld [vmem:[%s5018_s23 + $0x664] sm:$0xf]  ;;  %v3991_v36 = vor.u32 %v4449_v26, %v3988_v60 }
 0x128   : > { %2718 = vmatpush.bf16.msra.mxu3 %v3879_v6  ;;  %2680 = vmatpush.bf16.msra.mxu0 %v3679_v12  ;;  %v2452_v6 = vpop.f32.mrf.mxu2  ;;  %v4491_v12 = vld [vmem:[%s5018_s23 + $0x7e4] sm:$0xf] }
 0x129   : > { %2693 = vmatpush.bf16.msra.mxu1 %v3743_v41  ;;  %v4156_v41 = vld [vmem:[%s5018_s23 + $0x7e8] sm:$0xf0]  ;;  %v3943_v6 = vor.u32 %v4437_v59, %v3940_v0 }
 0x12a   : > { %v4159_v39 = vor.u32 %v4491_v12, %v4156_v41  ;;  %v3996_v12 = vld [vmem:[%s5018_s23 + $0x6a8] sm:$0xf0]  ;;  %v4467_v41 = vld [vmem:[%s5018_s23 + $0x724] sm:$0xf] }
 0x12b   : > { %2706 = vmatpush.bf16.msra.mxu2 %v3807_v17  ;;  %v3967_v17 = vor.u32 %v4443_v10, %v3964_v44  ;;  %v2412_v10 = vadd.f32 %v6187_v46, %v2399_v57  ;;  %v4485_v44 = vld [vmem:[%s5018_s23 + $0x7b4] sm:$0xf]  ;;  %v4044_v57 = vld [vmem:[%s5018_s23 + $0x708] sm:$0xf0] }
 0x12c   : > { %2719 = vmatpush.bf16.msra.mxu3 %v3871_v18  ;;  %2681 = vmatpush.bf16.msra.mxu0 %v3671_v48  ;;  %v3956_v18 = vld [vmem:[%s5018_s23 + $0x658] sm:$0xf0]  ;;  %v2465_v48 = vpop.f32.mrf.mxu3  ;;  %v4135_v46 = vor.u32 %v4485_v44, %v4132_v50  ;;  %v4499_v50 = vld [vmem:[%s5030_s24 + $0x20] sm:$0xff] }
 0x12d   : > { %2694 = vmatpush.bf16.msra.mxu1 %v3735_v54  ;;  %v6477_v54 = vld [vmem:[#allocation30_spill] sm:$0xff]  ;;  %v3959_v13 = vor.u32 %v4441_v47, %v3956_v18  ;;  %v4124_v47 = vld [vmem:[%s5018_s23 + $0x7a8] sm:$0xf0] }
 0x12f   : > { %2707 = vmatpush.bf16.msra.mxu2 %v3799_v32  ;;  %v4489_v32 = vld [vmem:[%s5018_s23 + $0x7d4] sm:$0xf] }
 0x130   : > { %2720 = vmatpush.bf16.msra.mxu3 %v3863_v51  ;;  %2682 = vmatpush.bf16.msra.mxu0 %v3663_v43  ;;  %v4023_v51 = vor.u32 %v4457_v3, %v4020_v33  ;;  %v4151_v52 = vor.u32 %v4489_v32, %v4148_v9  ;;  %v4076_v43 = vld [vmem:[%s5018_s23 + $0x748] sm:$0xf0]  ;;  %v3935_v3 = vor.u32 %v4435_v11, %v3932_v34  ;;  %v4433_v33 = vld [vmem:[%s5018_s23 + $0x614] sm:$0xf] }
 0x131   : > { %2695 = vmatpush.bf16.msra.mxu1 %v3727_v30  ;;  %v6292_v30 = vpop.f32.mrf.mxu0  ;;  %v4079_v4 = vor.u32 %v4471_v1, %v4076_v43  ;;  %v3980_v1 = vld [vmem:[%s5018_s23 + $0x688] sm:$0xf0]  ;;  %v4463_v43 = vld [vmem:[%s5018_s23 + $0x704] sm:$0xf]  ;;  %v4497_v11 = vld [vmem:[%s5030_s24 + $0x10] sm:$0xff] }
 0x132   : > { %v4047_v0 = vor.u32 %v4463_v43, %v4044_v57  ;;  %v4505_v57 = vld [vmem:[%s5030_s24 + $0x50] sm:$0xff] }
 0x133   : > { %2708 = vmatpush.bf16.msra.mxu2 %v3791_v40  ;;  %2683 = vmatmul.bf16.vlgmr.msra.gmra.mxu0 %v6475_v24  ;;  %v4015_v40 = vor.u32 %v4455_v2, %v4012_v37  ;;  %v3999_v24 = vor.u32 %v4451_v56, %v3996_v12  ;;  %v4431_v2 = vld [vmem:[%s5018_s23 + $0x604] sm:$0xf] }
 0x134   : > { %2721 = vmatpush.bf16.msra.mxu3 %v3855_v53  ;;  %2727 = vmatpush.bf16.msrb.mxu0 %v3975_v5  ;;  %v4453_v53 = vld [vmem:[%s5018_s23 + $0x6b4] sm:$0xf]  ;;  %v4004_v5 = vld [vmem:[%s5018_s23 + $0x6b8] sm:$0xf0]  ;;  %v6303_v23 = vpop.f32.mrf.mxu1  ;;  %v4447_v37 = vld [vmem:[%s5018_s23 + $0x684] sm:$0xf] }
 0x135   : > { %2740 = vmatpush.bf16.msrb.mxu1 %v4039_v28  ;;  %v4469_v28 = vld [vmem:[%s5018_s23 + $0x734] sm:$0xf]  ;;  %v3983_v59 = vor.u32 %v4447_v37, %v3980_v1  ;;  %v4506_v1 = vld [vmem:[%s5030_s24 + $0x58] sm:$0xff] }
 0x136   : > { %2709 = vmatmul.bf16.vlgmr.msra.gmra.mxu2 %v6476_v19  ;;  %2696 = vmatmul.bf16.vlgmr.msra.gmra.mxu1 %v6477_v54  ;;  %v4465_v19 = vld [vmem:[%s5018_s23 + $0x714] sm:$0xf]  ;;  %v4052_v54 = vld [vmem:[%s5018_s23 + $0x718] sm:$0xf0] }
 0x137   : > { %2753 = vmatpush.bf16.msrb.mxu2 %v4103_v38  ;;  %2722 = vmatmul.bf16.vlgmr.msra.gmra.mxu3 %v6478_v7  ;;  %v4068_v38 = vld [vmem:[%s5018_s23 + $0x738] sm:$0xf0]  ;;  %v4481_v7 = vld [vmem:[%s5018_s23 + $0x794] sm:$0xf]  ;;  %v4055_v58 = vor.u32 %v4465_v19, %v4052_v54 }
 0x138   : > { %2766 = vmatpush.bf16.msrb.mxu3 %v4167_v55  ;;  %2728 = vmatpush.bf16.msrb.mxu0 %v3967_v17  ;;  %v4007_v55 = vor.u32 %v4453_v53, %v4004_v5  ;;  %v4071_v14 = vor.u32 %v4469_v28, %v4068_v38  ;;  %v4060_v17 = vld [vmem:[%s5018_s23 + $0x728] sm:$0xf0]  ;;  %v6314_v18 = vpop.f32.mrf.mxu2  ;;  %v4501_v38 = vld [vmem:[%s5030_s24 + $0x30] sm:$0xff] }
 0x139   : > { %2741 = vmatpush.bf16.msrb.mxu1 %v4031_v61  ;;  %v2425_v61 = vadd.f32 %v6225_v49, %v2412_v10  ;;  %v2478_v48 = vpop.f32.mrf.mxu0 }
 0x13b   : > { %2754 = vmatpush.bf16.msrb.mxu2 %v4095_v62  ;;  %v4483_v62 = vld [vmem:[%s5018_s23 + $0x7a4] sm:$0xf]  ;;  %v2438_v32 = vadd.f32 %v6233_v20, %v2425_v61  ;;  %v2515_v9 = vpop.f32.mrf.mxu3 }
 0x13c   : > { %2767 = vmatpush.bf16.msrb.mxu3 %v4159_v39  ;;  %2729 = vmatpush.bf16.msrb.mxu0 %v3959_v13  ;;  %v4063_v39 = vor.u32 %v4467_v41, %v4060_v17  ;;  %v4127_v49 = vor.u32 %v4483_v62, %v4124_v47  ;;  %v4116_v13 = vld [vmem:[%s5018_s23 + $0x798] sm:$0xf0]  ;;  %v4495_v61 = vld [vmem:[%s5030_s24] sm:$0xff] }
 0x13d   : > { %2742 = vmatpush.bf16.msrb.mxu1 %v4023_v51  ;;  %v3927_v51 = vor.u32 %v4433_v33, %v3924_v63  ;;  %v4119_v20 = vor.u32 %v4481_v7, %v4116_v13  ;;  %v2451_v31 = vadd.f32 %v6235_v21, %v2438_v32 }
 0x13f   : > { %2755 = vmatpush.bf16.msrb.mxu2 %v4087_v45  ;;  %v2491_v45 = vpop.f32.mrf.mxu1  ;;  %v2464_v5 = vadd.f32 %v6253_v35, %v2451_v31  ;;  %v4500_v35 = vld [vmem:[%s5030_s24 + $0x28] sm:$0xff] }
 0x140   : > { %2768 = vmatpush.bf16.msrb.mxu3 %v4151_v52  ;;  %2730 = vmatpush.bf16.msrb.mxu0 %v3951_v27  ;;  %v3916_v52 = vld [vmem:[%s5018_s23 + $0x608] sm:$0xf0] }
 0x141   : > { %2743 = vmatpush.bf16.msrb.mxu1 %v4015_v40  ;;  %v4108_v27 = vld [vmem:[%s5018_s23 + $0x788] sm:$0xf0]  ;;  %v3919_v40 = vor.u32 %v4431_v2, %v3916_v52  ;;  %v2477_v21 = vadd.f32 %v6292_v30, %v2464_v5 }
 0x142   : > { %v4111_v53 = vor.u32 %v4479_v8, %v4108_v27  ;;  %v4508_v52 = vld [vmem:[%s5030_s24 + $0x68] sm:$0xff] }
 0x143   : > { %2756 = vmatpush.bf16.msrb.mxu2 %v4079_v4  ;;  %v2504_v4 = vpop.f32.mrf.mxu2  ;;  %v2517_v28 = vpop.f32.mrf.mxu3  ;;  %v2490_v10 = vadd.f32 %v6303_v23, %v2477_v21  ;;  %v4504_v27 = vld [vmem:[%s5030_s24 + $0x48] sm:$0xff] }
 0x144   : > { %2769 = vmatpush.bf16.msrb.mxu3 %v4143_v15  ;;  %2731 = vmatpush.bf16.msrb.mxu0 %v3943_v6  ;;  %v4502_v15 = vld [vmem:[%s5030_s24 + $0x38] sm:$0xff] }
 0x145   : > { %2744 = vmatpush.bf16.msrb.mxu1 %v4007_v55  ;;  %v2503_v30 = vadd.f32 %v6314_v18, %v2490_v10  ;;  %v967_v18 = vperm.slane %v6240_v42, 1 }
 0x147   : > { %2757 = vmatpush.bf16.msrb.mxu2 %v4071_v14 }
 0x148   : > { %2770 = vmatpush.bf16.msrb.mxu3 %v4135_v46  ;;  %2732 = vmatpush.bf16.msrb.mxu0 %v3935_v3  ;;  %v4496_v46 = vld [vmem:[%s5030_s24 + $0x8] sm:$0xff] }
 0x149   : > { %2745 = vmatpush.bf16.msrb.mxu1 %v3999_v24 }
 0x14b   : > { %2758 = vmatpush.bf16.msrb.mxu2 %v4063_v39 }
 0x14c   : > { %2771 = vmatpush.bf16.msrb.mxu3 %v4127_v49  ;;  %2733 = vmatpush.bf16.msrb.mxu0 %v3927_v51  ;;  %v4510_v51 = vld [vmem:[%s5030_s24 + $0x78] sm:$0xff] }
 0x14d   : > { %2746 = vmatpush.bf16.msrb.mxu1 %v3991_v36 }
 0x14f   : > { %2759 = vmatpush.bf16.msrb.mxu2 %v4055_v58  ;;  %v2528_v44 = vpop.f32.mrf.mxu0  ;;  %v4509_v58 = vld [vmem:[%s5030_s24 + $0x70] sm:$0xff] }
 0x150   : > { %2772 = vmatpush.bf16.msrb.mxu3 %v4119_v20  ;;  %2734 = vmatpush.bf16.msrb.mxu0 %v3919_v40  ;;  %v4507_v20 = vld [vmem:[%s5030_s24 + $0x60] sm:$0xff] }
 0x151   : > { %2747 = vmatpush.bf16.msrb.mxu1 %v3983_v59 }
 0x153   : > { %2760 = vmatpush.bf16.msrb.mxu2 %v4047_v0  ;;  %2735 = vmatmul.bf16.vlgmr.msrb.gmra.mxu0 %v6021_v22  ;;  %v2541_v6 = vpop.f32.mrf.mxu1  ;;  %v2516_v22 = vadd.f32 %v2515_v9, %v2503_v30 }
 0x154   : > { %2773 = vmatpush.bf16.msrb.mxu3 %v4111_v53  ;;  %2915 = vmatpush.bf16.msra.mxu0 %v4502_v15  ;;  %v4503_v15 = vld [vmem:[%s5030_s24 + $0x40] sm:$0xff] }
 0x155   : > { %2748 = vmatmul.bf16.vlgmr.msrb.gmra.mxu1 %v6040_v25  ;;  %v2529_v55 = vadd.f32 %v2528_v44, %v2516_v22  ;;  %v4498_v25 = vld [vmem:[%s5030_s24 + $0x18] sm:$0xff] }
 0x156   : > { %2761 = vmatmul.bf16.vlgmr.msrb.gmra.mxu2 %v6029_v16  ;;  %2928 = vmatpush.bf16.msra.mxu1 %v4510_v51 }
 0x157   : > { %2774 = vmatmul.bf16.vlgmr.msrb.gmra.mxu3 %v6047_v29  ;;  %v2542_v23 = vadd.f32 %v2541_v6, %v2529_v55  ;;  %v2530_v29 = vpop.f32.mrf.mxu0 }
 0x158   : > { %2916 = vmatpush.bf16.msra.mxu0 %v4501_v38 }
 0x159   : > { %v2554_v16 = vpop.f32.mrf.mxu2 }
 0x15a   : > { %v2567_v14 = vpop.f32.mrf.mxu3  ;;  %v2555_v56 = vadd.f32 %v2554_v16, %v2542_v23  ;;  %2929 = vmatpush.bf16.msra.mxu1 %v4509_v58 }
 0x15b   : > { %v2543_v34 = vpop.f32.mrf.mxu1 }
 0x15c   : > { %2917 = vmatpush.bf16.msra.mxu0 %v4500_v35  ;;  %v2568_v12 = vadd.f32 %v2567_v14, %v2555_v56 }
 0x15e   : > { %v2779_v62 = vmax.f32 %v2568_v12, 0.0  ;;  %2930 = vmatpush.bf16.msra.mxu1 %v4508_v52 }
 0x160   : > { %2918 = vmatpush.bf16.msra.mxu0 %v4499_v50  ;;  %v2781_v47 = vpack.c.bf16 %v2779_v62, %v2779_v62 }
 0x161   : > { %v2556_v41 = vpop.f32.mrf.mxu2 }
 0x162   : > { %v2569_v17 = vpop.f32.mrf.mxu3  ;;  %2931 = vmatpush.bf16.msra.mxu1 %v4507_v20 }
 0x164   : > { %2919 = vmatpush.bf16.msra.mxu0 %v4498_v25 }
 0x166   : > { %2932 = vmatpush.bf16.msra.mxu1 %v4506_v1 }
 0x168   : > { %2920 = vmatpush.bf16.msra.mxu0 %v4497_v11 }
 0x16a   : > { %2933 = vmatpush.bf16.msra.mxu1 %v4505_v57 }
 0x16c   : > { %2921 = vmatpush.bf16.msra.mxu0 %v4496_v46 }
 0x16e   : > { %2934 = vmatpush.bf16.msra.mxu1 %v4504_v27 }
 0x170   : > { %2922 = vmatpush.bf16.msra.mxu0 %v4495_v61  ;;  %v2580_v3 = vpop.f32.mrf.mxu0  ;;  %v4599_v61 = vld [vmem:[%s369_s30] ss:$0 sm:$0xff] }
 0x171   : > { %v2581_v24 = vadd.f32 %v2580_v3, %v967_v18 }
 0x172   : > { %2935 = vmatpush.bf16.msra.mxu1 %v4503_v15 }
 0x173   : > { %2923 = vmatmul.bf16.vlgmr.msra.gmra.mxu0 %v2781_v47  ;;  %v2593_v39 = vpop.f32.mrf.mxu1 }
 0x174   : > { %v2594_v33 = vadd.f32 %v2593_v39, %v2581_v24 }
 0x178   : > { %v2582_v60 = vpop.f32.mrf.mxu0 }
 0x179   : > { %v2606_v63 = vpop.f32.mrf.mxu2 }
 0x17a   : > { %v2607_v26 = vadd.f32 %v2606_v63, %v2594_v33  ;;  %v2619_v48 = vpop.f32.mrf.mxu3 }
 0x17b   : > { %v2595_v19 = vpop.f32.mrf.mxu1 }
 0x17c   : > { %v2620_v49 = vadd.f32 %v2619_v48, %v2607_v26 }
 0x181   : > { %v2608_v54 = vpop.f32.mrf.mxu2 }
 0x182   : > { %v2621_v32 = vpop.f32.mrf.mxu3 }
 0x190   : > { %v2632_v9 = vpop.f32.mrf.mxu0 }
 0x191   : > { %v2633_v8 = vadd.f32 %v2632_v9, %v2620_v49 }
 0x193   : > { %v2645_v7 = vpop.f32.mrf.mxu1 }
 0x194   : > { %v2646_v0 = vadd.f32 %v2645_v7, %v2633_v8 }
 0x198   : > { %v2634_v45 = vpop.f32.mrf.mxu0 }
 0x199   : > { %v2658_v42 = vpop.f32.mrf.mxu2 }
 0x19a   : > { %v2671_v13 = vpop.f32.mrf.mxu3  ;;  %v2659_v5 = vadd.f32 %v2658_v42, %v2646_v0 }
 0x19b   : > { %v2647_v36 = vpop.f32.mrf.mxu1 }
 0x19c   : > { %v2672_v38 = vadd.f32 %v2671_v13, %v2659_v5 }
 0x1a1   : > { %v2660_v2 = vpop.f32.mrf.mxu2 }
 0x1a2   : > { %v2673_v37 = vpop.f32.mrf.mxu3 }
 0x1b0   : > { %v2684_v43 = vpop.f32.mrf.mxu0 }
 0x1b1   : > { %v2685_v10 = vadd.f32 %v2684_v43, %v2672_v38 }
 0x1b3   : > { %v2697_v31 = vpop.f32.mrf.mxu1 }
 0x1b4   : > { %v2698_v35 = vadd.f32 %v2697_v31, %v2685_v10 }
 0x1b8   : > { %v2686_v59 = vpop.f32.mrf.mxu0 }
 0x1b9   : > { %v2710_v40 = vpop.f32.mrf.mxu2 }
 0x1ba   : > { %v2723_v4 = vpop.f32.mrf.mxu3  ;;  %v2711_v30 = vadd.f32 %v2710_v40, %v2698_v35 }
 0x1bb   : > { %v2699_v53 = vpop.f32.mrf.mxu1 }
 0x1bc   : > { %v2724_v44 = vadd.f32 %v2723_v4, %v2711_v30 }
 0x1c1   : > { %v2712_v28 = vpop.f32.mrf.mxu2 }
 0x1c2   : > { %v2725_v21 = vpop.f32.mrf.mxu3 }
 0x1d0   : > { %v2736_v50 = vpop.f32.mrf.mxu0 }
 0x1d1   : > { %v2737_v22 = vadd.f32 %v2736_v50, %v2724_v44 }
 0x1d2   : > { %v2749_v6 = vpop.f32.mrf.mxu1 }
 0x1d3   : > { %v2750_v55 = vadd.f32 %v2749_v6, %v2737_v22 }
 0x1d8   : > { %v2738_v14 = vpop.f32.mrf.mxu0 }
 0x1d9   : > { %v2762_v25 = vpop.f32.mrf.mxu2 }
 0x1da   : > { %v2763_v16 = vadd.f32 %v2762_v25, %v2750_v55  ;;  %v2775_v23 = vpop.f32.mrf.mxu3  ;;  %v2751_v29 = vpop.f32.mrf.mxu1 }
 0x1dc   : > { %v2776_v11 = vadd.f32 %v2775_v23, %v2763_v16 }
 0x1de   : > { %v2780_v34 = vmax.f32 %v2776_v11, 0.0 }
 0x1e0   : > { %v2782_v56 = vpack.c.bf16 %v2780_v34, %v2780_v34 }
 0x1e1   : > { %v2764_v46 = vpop.f32.mrf.mxu2 }
 0x1e2   : > { %v2777_v12 = vpop.f32.mrf.mxu3  ;;  %2936 = vmatmul.bf16.vlgmr.msra.gmra.mxu1 %v2782_v56 }
 0x1f0   : > { %v2924_v41 = vpop.f32.mrf.mxu0 }
 0x1f1   : > { %v2925_v62 = vadd.f32 %v4599_v61, %v2924_v41 }
 0x1f8   : > { %v2926_v17 = vpop.f32.mrf.mxu0 }
 0x25f   : > { %v2937_v47 = vpop.f32.mrf.mxu1 }
 0x260   : > { %v2938_v18 = vadd.f32 %v2937_v47, %v2925_v62 }
 0x262   : > { %2941 = vst [vmem:[%s415_s18] sm:$0x3] %v2938_v18 }
 0x263   : > { %4777 = shalt.err (!%p4774_p10)
}
 0x264   : > { %4521 = dma.vmem_to_hbm [thread:$0]  (%p4933_p9), %s2957_s28, 32, %s2959_s27, %s2943_s13  }
 0x267   : > { %v2939_v3 = vpop.f32.mrf.mxu1 }
 0x268 PF: > { %s6482_s0 = sld [smem:[#allocation19_spill]] }
 0x269   : > { %s6483_s21 = sld [smem:[#allocation16_spill]] }
 0x26e   : > { %p4544_p12 = scmp.ge.s32.totalorder %s6482_s0, 2 }
 0x26f   : > { %s2970_s6 = sand.u32 1, %s6483_s21  }
 0x270   : > { %p4540_p13 = pnand %p4544_p12, %p4940_p11  ;;  %s2971_s8 = scalar_lea.sflag [#allocation4], %s2970_s6 }
 0x272   : > { %p4541_p0 = pneg %p4540_p13 }
 0x274   : > { %4815 = dma.done.wait (%p4541_p0), %s2971_s8, 32  }
 0x275   : > { %4817 = vsyncadd (%p4541_p0), %s2971_s8, 4294967264  ;;  %s27_s23 = sadd.s32 1, %s6482_s0   ;;  %s6485_s9 = sld [smem:[#allocation17_spill]] }
 0x276   : > { %p24_p1 = scmp.ge.s32.totalorder %s27_s23, 6   ;;  %s6486_s20 = sld [smem:[#allocation22_spill]] }
 0x277   : > { %s6487_s11 = sld [smem:[#allocation20_spill]]  ;;  %s6488_s18 = smov %s4824_s19 }
 0x278   : > { %s6490_s21 = smov %s4836_s22 }
 0x279   :  { %26 = sbr.rel (!%p24_p1) target bundleno = 15 (0xf), region = 134 }
 0x27b   : > { %s6489_s19 = smov %s6485_s9 }
 0x27d   : > { %s6491_s22 = smov %s6487_s11 }
 0x27e   :  { %2977 = vsyncpa [#allocation3], 1 }
 0x27f   :  { %2979 = vsyncpa [#allocation3 + $0x1], 1 }
 0x280   :  { %2980 = vsyncpa [#allocation6], 1 }
 0x281   :  { %2982 = vsyncpa [#allocation6 + $0x1], 1 }
 0x282   :  { %2983 = vsyncpa [#allocation9], 1 }
 0x283   :  { %2985 = vsyncpa [#allocation9 + $0x1], 1 }
 0x284   :  { %2986 = vsyncpa [#allocation4], 1 }
 0x285   :  { %2988 = vsyncpa [#allocation4 + $0x1], 1 }

</bundles_post_ra>
